<compile_context>
chip_gen: v7x
topology: tpu7x:2x2x1
jax: 0.10.0
libtpu: 0.0.40
codegen_flags: <defaults>
</compile_context>

<pallas_src>
import functools
import math

import jax
import jax.numpy as jnp
from jax import lax
from jax.experimental import pallas as pl
from jax.experimental.pallas import tpu as pltpu


# ----------------------------------------------------------------------------
# hardware / tile-size helpers
# ----------------------------------------------------------------------------
@functools.lru_cache(maxsize=None)
def _vmem_limit_bytes():
    """Scoped VMEM limit derived from the chip: ~96 MiB on 128 MiB parts
    (v5e/v6e), ~48 MiB on 64 MiB parts (v7x)."""
    phys = 128 * 1024 * 1024
    try:
        info = pltpu.get_tpu_info()
        phys = int(getattr(info, "vmem_capacity_bytes", phys) or phys)
    except Exception:
        pass
    return max(32 * 1024 * 1024, min(100 * 1024 * 1024, (phys * 3) // 4))


def _pick_tile(dim, target, align):
    """Largest tile <= target that is a multiple of `align` and divides `dim`;
    falls back to the full dim (always legal) if none exists."""
    if dim <= target:
        return dim
    t = (target // align) * align
    while t >= align and dim % t:
        t -= align
    return t if (t >= align and dim % t == 0) else dim


def _pick_head_block(num_heads, L, S, hd, itemsize, budget, need_weights):
    """Heads batched per attention grid step.  Candidates must divide H and
    keep the (head, hd) block dims tiling-legal (== full head dim, or a
    multiple of 8).  The VMEM budget counts the double-buffered q/k/v/out
    blocks, the per-head f32 score/exp temporaries, the f32 weight accumulator
    scratch and the double-buffered weights output block."""
    legal = [d for d in range(1, num_heads + 1)
             if num_heads % d == 0 and (d == num_heads or d % 8 == 0)]
    fixed = (4 * L * S + 2 * itemsize * L * S) if need_weights else 0

    def vmem_cost(hb):
        per_head = (2 * itemsize * (L + 2 * S) * hd      # dbl-buffered q/k/v
                    + 2 * itemsize * L * hd              # dbl-buffered out
                    + 3 * 4 * L * S)                     # f32 score/exp/prob
        return fixed + hb * per_head

    fitting = [d for d in legal if vmem_cost(d) <= budget]
    return max(fitting) if fitting else min(legal)


# ----------------------------------------------------------------------------
# tiled GEMM (linear) kernel: y = x @ w.T + b   (torch weight layout)
# ----------------------------------------------------------------------------
def _gemm_kernel(x_ref, w_ref, b_ref, o_ref, acc_ref):
    kk = pl.program_id(2)

    @pl.when(kk == 0)
    def _():
        acc_ref[...] = jnp.zeros_like(acc_ref)

    # Contract x's last dim with w's last dim (torch (E_out, E_in) layout) ->
    # MXU handles the orientation, no weight transpose anywhere.
    acc_ref[...] += lax.dot_general(
        x_ref[...], w_ref[...],
        dimension_numbers=(((1,), (1,)), ((), ())),
        preferred_element_type=jnp.float32,
    )

    @pl.when(kk == pl.num_programs(2) - 1)
    def _():
        o_ref[...] = (acc_ref[...] + b_ref[...]).astype(o_ref.dtype)


def pallas_linear(x, w, b, *, tm=512, tn=512, tk=512):
    """x: (T, E_in); w: (E_out, E_in) torch layout; b: (E_out,) -> (T, E_out)."""
    T, E_in = x.shape
    E_out = w.shape[0]
    tm = _pick_tile(T, tm, 8)
    tn = _pick_tile(E_out, tn, 128)
    tk = _pick_tile(E_in, tk, 128)
    grid = (T // tm, E_out // tn, E_in // tk)
    b2 = b.reshape(1, E_out)

    cost = pl.CostEstimate(
        flops=2 * T * E_in * E_out,
        transcendentals=0,
        bytes_accessed=(x.size + w.size + b.size + T * E_out) * x.dtype.itemsize,
    )

    return pl.pallas_call(
        _gemm_kernel,
        grid=grid,
        out_shape=jax.ShapeDtypeStruct((T, E_out), x.dtype),
        in_specs=[
            pl.BlockSpec((tm, tk), lambda i, j, kk: (i, kk)),
            pl.BlockSpec((tn, tk), lambda i, j, kk: (j, kk)),
            pl.BlockSpec((1, tn), lambda i, j, kk: (0, j)),
        ],
        out_specs=pl.BlockSpec((tm, tn), lambda i, j, kk: (i, j)),
        scratch_shapes=[pltpu.VMEM((tm, tn), jnp.float32)],
        compiler_params=pltpu.CompilerParams(
            dimension_semantics=("parallel", "parallel", "arbitrary"),
            vmem_limit_bytes=_vmem_limit_bytes(),
        ),
        cost_estimate=cost,
    )(x, w, b2)


# ----------------------------------------------------------------------------
# attention core: softmax(q k^T) v, reading q/k/v head-blocks straight out of
# the token-major projection output (no HBM relayouts), Hb heads per grid
# step, head-averaged attention weights accumulated in VMEM.
# ----------------------------------------------------------------------------
def pallas_attention_core(q_arr, k_arr, v_arr, *, q_group, k_group, v_group,
                          num_heads, need_weights=True):
    """q_arr: (L, N, Gq, H, hd); k_arr/v_arr: (S, N, Gk/Gv, H, hd).
    q is pre-scaled by 1/sqrt(hd) (folded into Wq).  The *_group index selects
    which slot along axis 2 holds the respective tensor, so fused QKV / KV
    projection outputs are consumed in place (no HBM slicing).
    Returns (out (L, N, H, hd), weights (N, L, S) head-averaged or None)."""
    L, N, _, H, hd = q_arr.shape
    S = k_arr.shape[0]
    dt = q_arr.dtype
    E = H * hd

    vmem_limit = _vmem_limit_bytes()
    Hb = _pick_head_block(H, L, S, hd, dt.itemsize,
                          budget=vmem_limit // 2, need_weights=need_weights)
    n_hb = H // Hb
    inv_h = 1.0 / H

    def kernel(q_ref, k_ref, v_ref, *rest):
        # q_ref: (L, Hb, hd); k_ref/v_ref: (S, Hb, hd); o_ref: (L, Hb, hd)
        if need_weights:
            o_ref, w_ref, w_acc = rest
        else:
            (o_ref,) = rest

        w_sum = None
        # TODO(synk): flash-style S tiling (online softmax) for very long
        #             sequences so the (L, S) f32 tiles fit v7x's 64 MiB VMEM.
        for h in range(Hb):                      # static unroll, Hb is small
            qh = q_ref[:, h, :]                  # (L, hd)  VMEM slice
            kh = k_ref[:, h, :]                  # (S, hd)
            vh = v_ref[:, h, :]                  # (S, hd)
            # contract the hd dims directly -> no K transpose anywhere
            s = lax.dot_general(qh, kh, (((1,), (1,)), ((), ())),
                                preferred_element_type=jnp.float32)   # (L, S)
            m = jnp.max(s, axis=-1, keepdims=True)
            e = jnp.exp(s - m)
            denom = jnp.sum(e, axis=-1, keepdims=True)
            if need_weights:
                # exact reciprocal keeps the f32 reference tolerance
                p = e * pl.reciprocal(denom, approx=False)            # (L, S)
                oh = lax.dot_general(p.astype(vh.dtype), vh,
                                     (((1,), (0,)), ((), ())),
                                     preferred_element_type=jnp.float32)
                w_sum = p if w_sum is None else w_sum + p
            else:
                # Deferred normalization: scale the small (L, hd) output tile
                # instead of the (L, S) probabilities; divide on the EUP.
                oh = lax.dot_general(e.astype(vh.dtype), vh,
                                     (((1,), (0,)), ((), ())),
                                     preferred_element_type=jnp.float32)
                oh = oh * pl.reciprocal(denom, approx=True)
            o_ref[:, h, :] = oh.astype(o_ref.dtype)                   # (L, hd)

        if need_weights:
            hb = pl.program_id(1)

            @pl.when(hb == 0)
            def _():
                w_acc[...] = jnp.zeros_like(w_acc)

            w_acc[...] += w_sum

            @pl.when(hb == pl.num_programs(1) - 1)
            def _():
                w_ref[...] = (w_acc[...] * inv_h).astype(w_ref.dtype)

    def make_in_spec(group, seq):
        # block (seq, 1, 1, Hb, hd); last two block dims (Hb, hd) are either
        # the full dims or 8/128-aligned (enforced by _pick_head_block).
        return pl.BlockSpec((seq, None, None, Hb, hd),
                            lambda n, hb, g=group: (0, n, g, hb, 0))

    in_specs = [make_in_spec(q_group, L),
                make_in_spec(k_group, S),
                make_in_spec(v_group, S)]
    o_spec = pl.BlockSpec((L, None, Hb, hd), lambda n, hb: (0, n, hb, 0))

    if need_weights:
        out_shape = (jax.ShapeDtypeStruct((L, N, H, hd), dt),
                     jax.ShapeDtypeStruct((N, L, S), dt))
        out_specs = (o_spec, pl.BlockSpec((None, L, S), lambda n, hb: (n, 0, 0)))
        scratch = [pltpu.VMEM((L, S), jnp.float32)]
        dim_sem = ("parallel", "arbitrary")      # weights accumulate over heads
    else:
        out_shape = jax.ShapeDtypeStruct((L, N, H, hd), dt)
        out_specs = o_spec
        scratch = []
        dim_sem = ("parallel", "parallel")

    bytes_accessed = (2 * L * N * E + 2 * S * N * E) * dt.itemsize
    if need_weights:
        bytes_accessed += N * L * S * dt.itemsize
    cost = pl.CostEstimate(flops=4 * N * H * L * S * hd,
                           transcendentals=N * H * L * S,
                           bytes_accessed=bytes_accessed)

    res = pl.pallas_call(
        kernel,
        grid=(N, n_hb),
        out_shape=out_shape,
        in_specs=in_specs,
        out_specs=out_specs,
        scratch_shapes=scratch,
        compiler_params=pltpu.CompilerParams(
            dimension_semantics=dim_sem,
            vmem_limit_bytes=vmem_limit,
        ),
        cost_estimate=cost,
    )(q_arr, k_arr, v_arr)

    if need_weights:
        return res[0], res[1]
    return res, None


# ----------------------------------------------------------------------------
# MultiheadAttnWrap forward
# ----------------------------------------------------------------------------
def multihead_attn_forward(query, key, value, params, num_heads,
                           need_weights=True):
    """nn.MultiheadAttention forward (batch_first=False, add_bias_kv=False).
    query: (L, N, E); key/value: (S, N, E).
    Returns (attn_output (L, N, E), attn_weights (N, L, S) head-averaged)."""
    L, N, E = query.shape
    S = key.shape[0]
    H = num_heads
    if E % H != 0:
        raise ValueError(f"embed_dim {E} not divisible by num_heads {H}")
    hd = E // H
    scale = 1.0 / math.sqrt(hd)

    w_in = params["in_proj_weight"]            # (3E, E), torch layout
    b_in = params["in_proj_bias"]              # (3E,)
    # Fold 1/sqrt(head_dim) into the Q projection -> the attention kernel does
    # zero per-element scaling on the (L, S) score tile.
    w_q = w_in[:E] * scale
    b_q = b_in[:E] * scale
    w_k, w_v = w_in[E:2 * E], w_in[2 * E:]
    b_k, b_v = b_in[E:2 * E], b_in[2 * E:]

    if (query is key) and (key is value):
        # Self-attention fast path: ONE fused GEMM with the full (3E, E)
        # in_proj weight; the activation is read from HBM exactly once.  The
        # reshape to (L, N, 3, H, hd) is free (contiguous), and the attention
        # kernel slices q/k/v head-blocks out of it via its BlockSpecs.
        w_qkv = jnp.concatenate([w_q, w_k, w_v], axis=0)
        b_qkv = jnp.concatenate([b_q, b_k, b_v], axis=0)
        qkv = pallas_linear(query.reshape(L * N, E), w_qkv, b_qkv)   # (L*N, 3E)
        qkv5 = qkv.reshape(L, N, 3, H, hd)                            # free
        q_arr = k_arr = v_arr = qkv5
        qg, kg, vg = 0, 1, 2
    elif key is value:
        # Encoder-decoder style cross-attention: fuse K/V into one GEMM so the
        # key/value activation is read from HBM once.
        q_arr = pallas_linear(query.reshape(L * N, E), w_q, b_q
                              ).reshape(L, N, 1, H, hd)
        w_kv = jnp.concatenate([w_k, w_v], axis=0)
        b_kv = jnp.concatenate([b_k, b_v], axis=0)
        kv = pallas_linear(key.reshape(S * N, E), w_kv, b_kv
                           ).reshape(S, N, 2, H, hd)
        k_arr = v_arr = kv
        qg, kg, vg = 0, 0, 1
    else:
        q_arr = pallas_linear(query.reshape(L * N, E), w_q, b_q
                              ).reshape(L, N, 1, H, hd)
        k_arr = pallas_linear(key.reshape(S * N, E), w_k, b_k
                              ).reshape(S, N, 1, H, hd)
        v_arr = pallas_linear(value.reshape(S * N, E), w_v, b_v
                              ).reshape(S, N, 1, H, hd)
        qg = kg = vg = 0

    attn_out, attn_w = pallas_attention_core(
        q_arr, k_arr, v_arr, q_group=qg, k_group=kg, v_group=vg,
        num_heads=H, need_weights=need_weights)

    # attn_out is (L, N, H, hd): the reshape to (L*N, E) is free -> the head
    # merge costs no HBM pass.  Output projection, then final (L, N, E) view.
    out = pallas_linear(attn_out.reshape(L * N, E),
                        params["out_proj_weight"], params["out_proj_bias"])
    return out.reshape(L, N, E), attn_w


@functools.partial(jax.jit, static_argnums=(2, 3))
def mha_self_attention(x, params, num_heads, need_weights=True):
    # same traced value passed three times -> fused QKV path inside the jit
    return multihead_attn_forward(x, x, x, params, num_heads, need_weights)


@functools.partial(jax.jit, static_argnums=(4,))
def mha_cross_attention(query, key, value, params, num_heads):
    return multihead_attn_forward(query, key, value, params, num_heads)


@functools.partial(jax.jit, static_argnums=(3,))
def mha_kv_cross_attention(query, kv, params, num_heads):
    # same traced value for key/value -> fused KV projection path
    return multihead_attn_forward(query, kv, kv, params, num_heads)


# ----------------------------------------------------------------------------
# pure-JAX reference
# ----------------------------------------------------------------------------
def _reference(query, key, value, params, num_heads):
    L, N, E = query.shape
    S = key.shape[0]
    H = num_heads
    hd = E // H
    W = params["in_proj_weight"]
    b = params["in_proj_bias"]
    q = query @ W[:E].T + b[:E]
    k = key @ W[E:2 * E].T + b[E:2 * E]
    v = value @ W[2 * E:].T + b[2 * E:]
    q = q.reshape(L, N, H, hd).transpose(1, 2, 0, 3)
    k = k.reshape(S, N, H, hd).transpose(1, 2, 0, 3)
    v = v.reshape(S, N, H, hd).transpose(1, 2, 0, 3)
    s = jnp.einsum("nhld,nhsd->nhls", q, k) / math.sqrt(hd)
    p = jax.nn.softmax(s, axis=-1)
    o = jnp.einsum("nhls,nhsd->nhld", p, v)
    o = o.transpose(2, 0, 1, 3).reshape(L * N, E)
    o = o @ params["out_proj_weight"].T + params["out_proj_bias"]
    return o.reshape(L, N, E), p.mean(axis=1)


if __name__ == "__main__":
    L = 8           # target sequence length
    N = 2           # batch
    E = 32          # embed_dim
    H = 4           # num_heads

    root = jax.random.PRNGKey(0)
    kx, kq, kk, kv, kw1, kb1, kw2, kb2 = jax.random.split(root, 8)

    xav = math.sqrt(6.0 / (E + 3 * E))
    params = {
        "in_proj_weight": jax.random.uniform(
            kw1, (3 * E, E), minval=-xav, maxval=xav, dtype=jnp.float32),
        "in_proj_bias": 0.02 * jax.random.normal(kb1, (3 * E,), dtype=jnp.float32),
        "out_proj_weight": jax.random.uniform(
            kw2, (E, E), minval=-1.0 / math.sqrt(E), maxval=1.0 / math.sqrt(E),
            dtype=jnp.float32),
        "out_proj_bias": 0.02 * jax.random.normal(kb2, (E,), dtype=jnp.float32),
    }

    # --- test 1: self-attention (fused QKV GEMM path) -------------------------
    x = jax.random.normal(kx, (L, N, E), dtype=jnp.float32)
    out1, w1 = mha_self_attention(x, params, H)
    jax.block_until_ready((out1, w1))
    ref1, refw1 = _reference(x, x, x, params, H)
    assert out1.shape == (L, N, E) and w1.shape == (N, L, L)
    assert jnp.allclose(out1, ref1, atol=2e-4, rtol=2e-4)
    assert jnp.allclose(w1, refw1, atol=2e-4, rtol=2e-4)

    # --- test 2: cross-attention (distinct k/v, S != L) -----------------------
    S2 = 16
    q2 = jax.random.normal(kq, (L, N, E), dtype=jnp.float32)
    k2 = jax.random.normal(kk, (S2, N, E), dtype=jnp.float32)
    v2 = jax.random.normal(kv, (S2, N, E), dtype=jnp.float32)
    out2, w2 = mha_cross_attention(q2, k2, v2, params, H)
    jax.block_until_ready((out2, w2))
    ref2, refw2 = _reference(q2, k2, v2, params, H)
    assert out2.shape == (L, N, E) and w2.shape == (N, L, S2)
    assert jnp.allclose(out2, ref2, atol=2e-4, rtol=2e-4)
    assert jnp.allclose(w2, refw2, atol=2e-4, rtol=2e-4)

    # --- test 3: cross-attention with key is value (fused KV GEMM path) -------
    out3, w3 = mha_kv_cross_attention(q2, k2, params, H)
    jax.block_until_ready((out3, w3))
    ref3, refw3 = _reference(q2, k2, k2, params, H)
    assert out3.shape == (L, N, E) and w3.shape == (N, L, S2)
    assert jnp.allclose(out3, ref3, atol=2e-4, rtol=2e-4)
    assert jnp.allclose(w3, refw3, atol=2e-4, rtol=2e-4)

    # --- test 4: need_weights=False (deferred normalization, approx recip) ----
    out4, w4 = mha_self_attention(x, params, H, False)
    jax.block_until_ready(out4)
    assert w4 is None
    assert jnp.allclose(out4, ref1, atol=3e-2, rtol=3e-2)  # approx reciprocal

    print("KERNEL_OK")
</pallas_src>

<mosaic_0001>
module attributes {stable_mosaic.version = 11 : i64} {
  func.func @kernel(%arg0: i32, %arg1: i32, %arg2: memref<8x1x1x4x8xf32, #tpu.memory_space<vmem>>, %arg3: memref<8x1x1x4x8xf32, #tpu.memory_space<vmem>>, %arg4: memref<8x1x1x4x8xf32, #tpu.memory_space<vmem>>, %arg5: memref<8x1x4x8xf32, #tpu.memory_space<vmem>>, %arg6: memref<1x8x8xf32, #tpu.memory_space<vmem>>, %arg7: memref<8x8xf32, #tpu.memory_space<vmem>>) attributes {dimension_semantics = [#tpu.dimension_semantics<parallel>, #tpu.dimension_semantics<arbitrary>], iteration_bounds = array<i64: 2, 1>, scalar_prefetch = 0 : i64, scratch_operands = 1 : i64, tpu.core_type = #tpu.core_type<tc>, window_params = [{transform_indices = @transform_0, window_bounds = array<i64: 8, 1, 1, 4, 8>}, {transform_indices = @transform_1, window_bounds = array<i64: 8, 1, 1, 4, 8>}, {transform_indices = @transform_2, window_bounds = array<i64: 8, 1, 1, 4, 8>}, {transform_indices = @transform_3, window_bounds = array<i64: 8, 1, 4, 8>}, {transform_indices = @transform_4, window_bounds = array<i64: 1, 8, 8>}]} {
    %c0 = arith.constant 0 : index
    %c0_0 = arith.constant 0 : index
    %c0_1 = arith.constant 0 : index
    %c0_2 = arith.constant 0 : index
    %c0_3 = arith.constant 0 : index
    %0 = vector.load %arg2[%c0, %c0_0, %c0_1, %c0_2, %c0_3] : memref<8x1x1x4x8xf32, #tpu.memory_space<vmem>>, vector<8x1x1x1x8xf32>
    %1 = vector.shape_cast %0 : vector<8x1x1x1x8xf32> to vector<8x8xf32>
    %c0_4 = arith.constant 0 : index
    %c0_5 = arith.constant 0 : index
    %c0_6 = arith.constant 0 : index
    %c0_7 = arith.constant 0 : index
    %c0_8 = arith.constant 0 : index
    %2 = vector.load %arg3[%c0_4, %c0_5, %c0_6, %c0_7, %c0_8] : memref<8x1x1x4x8xf32, #tpu.memory_space<vmem>>, vector<8x1x1x1x8xf32>
    %3 = vector.shape_cast %2 : vector<8x1x1x1x8xf32> to vector<8x8xf32>
    %c0_9 = arith.constant 0 : index
    %c0_10 = arith.constant 0 : index
    %c0_11 = arith.constant 0 : index
    %c0_12 = arith.constant 0 : index
    %c0_13 = arith.constant 0 : index
    %4 = vector.load %arg4[%c0_9, %c0_10, %c0_11, %c0_12, %c0_13] : memref<8x1x1x4x8xf32, #tpu.memory_space<vmem>>, vector<8x1x1x1x8xf32>
    %5 = vector.shape_cast %4 : vector<8x1x1x1x8xf32> to vector<8x8xf32>
    %cst = arith.constant dense<0.000000e+00> : vector<8x8xf32>
    %6 = tpu.matmul %1, %3, %cst {dimension_numbers = #tpu.dot_dimension_numbers<[1], [1], [0], [0], [0, 0, 1, 0], [], []>} : vector<8x8xf32>, vector<8x8xf32>, vector<8x8xf32> -> vector<8x8xf32>
    %cst_14 = arith.constant dense<0xFF800000> : vector<8xf32>
    %7 = vector.multi_reduction <maximumf>, %6, %cst_14 [1] : vector<8x8xf32> to vector<8xf32>
    %8 = vector.shape_cast %7 : vector<8xf32> to vector<8x1xf32>
    %9 = vector.broadcast %8 : vector<8x1xf32> to vector<8x8xf32>
    %10 = arith.subf %6, %9 : vector<8x8xf32>
    %11 = math.exp %10 : vector<8x8xf32>
    %cst_15 = arith.constant dense<0.000000e+00> : vector<8xf32>
    %12 = vector.multi_reduction <add>, %11, %cst_15 [1] : vector<8x8xf32> to vector<8xf32>
    %13 = vector.shape_cast %12 : vector<8xf32> to vector<8x1xf32>
    %14 = tpu.reciprocal %13 : vector<8x1xf32> -> vector<8x1xf32>
    %15 = vector.broadcast %14 : vector<8x1xf32> to vector<8x8xf32>
    %16 = arith.mulf %11, %15 : vector<8x8xf32>
    %cst_16 = arith.constant dense<0.000000e+00> : vector<8x8xf32>
    %17 = tpu.matmul %16, %5, %cst_16 {dimension_numbers = #tpu.dot_dimension_numbers<[1], [0], [0], [1], [0, 0, 1, 1], [], []>} : vector<8x8xf32>, vector<8x8xf32>, vector<8x8xf32> -> vector<8x8xf32>
    %c0_17 = arith.constant 0 : index
    %c0_18 = arith.constant 0 : index
    %c0_19 = arith.constant 0 : index
    %c0_20 = arith.constant 0 : index
    %18 = vector.load %arg5[%c0_17, %c0_18, %c0_19, %c0_20] : memref<8x1x4x8xf32, #tpu.memory_space<vmem>>, vector<8x1x1x8xf32>
    %19 = vector.shape_cast %18 : vector<8x1x1x8xf32> to vector<8x8xf32>
    %20 = vector.shape_cast %17 : vector<8x8xf32> to vector<8x1x1x8xf32>
    tpu.vector_store %arg5[%c0_17, %c0_18, %c0_19, %c0_20], %20 {strides = array<i32>} : memref<8x1x4x8xf32, #tpu.memory_space<vmem>>, vector<8x1x1x8xf32>,
    %c0_21 = arith.constant 0 : index
    %c0_22 = arith.constant 0 : index
    %c0_23 = arith.constant 0 : index
    %c1 = arith.constant 1 : index
    %c0_24 = arith.constant 0 : index
    %21 = vector.load %arg2[%c0_21, %c0_22, %c0_23, %c1, %c0_24] : memref<8x1x1x4x8xf32, #tpu.memory_space<vmem>>, vector<8x1x1x1x8xf32>
    %22 = vector.shape_cast %21 : vector<8x1x1x1x8xf32> to vector<8x8xf32>
    %c0_25 = arith.constant 0 : index
    %c0_26 = arith.constant 0 : index
    %c0_27 = arith.constant 0 : index
    %c1_28 = arith.constant 1 : index
    %c0_29 = arith.constant 0 : index
    %23 = vector.load %arg3[%c0_25, %c0_26, %c0_27, %c1_28, %c0_29] : memref<8x1x1x4x8xf32, #tpu.memory_space<vmem>>, vector<8x1x1x1x8xf32>
    %24 = vector.shape_cast %23 : vector<8x1x1x1x8xf32> to vector<8x8xf32>
    %c0_30 = arith.constant 0 : index
    %c0_31 = arith.constant 0 : index
    %c0_32 = arith.constant 0 : index
    %c1_33 = arith.constant 1 : index
    %c0_34 = arith.constant 0 : index
    %25 = vector.load %arg4[%c0_30, %c0_31, %c0_32, %c1_33, %c0_34] : memref<8x1x1x4x8xf32, #tpu.memory_space<vmem>>, vector<8x1x1x1x8xf32>
    %26 = vector.shape_cast %25 : vector<8x1x1x1x8xf32> to vector<8x8xf32>
    %cst_35 = arith.constant dense<0.000000e+00> : vector<8x8xf32>
    %27 = tpu.matmul %22, %24, %cst_35 {dimension_numbers = #tpu.dot_dimension_numbers<[1], [1], [0], [0], [0, 0, 1, 0], [], []>} : vector<8x8xf32>, vector<8x8xf32>, vector<8x8xf32> -> vector<8x8xf32>
    %cst_36 = arith.constant dense<0xFF800000> : vector<8xf32>
    %28 = vector.multi_reduction <maximumf>, %27, %cst_36 [1] : vector<8x8xf32> to vector<8xf32>
    %29 = vector.shape_cast %28 : vector<8xf32> to vector<8x1xf32>
    %30 = vector.broadcast %29 : vector<8x1xf32> to vector<8x8xf32>
    %31 = arith.subf %27, %30 : vector<8x8xf32>
    %32 = math.exp %31 : vector<8x8xf32>
    %cst_37 = arith.constant dense<0.000000e+00> : vector<8xf32>
    %33 = vector.multi_reduction <add>, %32, %cst_37 [1] : vector<8x8xf32> to vector<8xf32>
    %34 = vector.shape_cast %33 : vector<8xf32> to vector<8x1xf32>
    %35 = tpu.reciprocal %34 : vector<8x1xf32> -> vector<8x1xf32>
    %36 = vector.broadcast %35 : vector<8x1xf32> to vector<8x8xf32>
    %37 = arith.mulf %32, %36 : vector<8x8xf32>
    %cst_38 = arith.constant dense<0.000000e+00> : vector<8x8xf32>
    %38 = tpu.matmul %37, %26, %cst_38 {dimension_numbers = #tpu.dot_dimension_numbers<[1], [0], [0], [1], [0, 0, 1, 1], [], []>} : vector<8x8xf32>, vector<8x8xf32>, vector<8x8xf32> -> vector<8x8xf32>
    %39 = arith.addf %16, %37 : vector<8x8xf32>
    %c0_39 = arith.constant 0 : index
    %c0_40 = arith.constant 0 : index
    %c1_41 = arith.constant 1 : index
    %c0_42 = arith.constant 0 : index
    %40 = vector.load %arg5[%c0_39, %c0_40, %c1_41, %c0_42] : memref<8x1x4x8xf32, #tpu.memory_space<vmem>>, vector<8x1x1x8xf32>
    %41 = vector.shape_cast %40 : vector<8x1x1x8xf32> to vector<8x8xf32>
    %42 = vector.shape_cast %38 : vector<8x8xf32> to vector<8x1x1x8xf32>
    tpu.vector_store %arg5[%c0_39, %c0_40, %c1_41, %c0_42], %42 {strides = array<i32>} : memref<8x1x4x8xf32, #tpu.memory_space<vmem>>, vector<8x1x1x8xf32>,
    %c0_43 = arith.constant 0 : index
    %c0_44 = arith.constant 0 : index
    %c0_45 = arith.constant 0 : index
    %c2 = arith.constant 2 : index
    %c0_46 = arith.constant 0 : index
    %43 = vector.load %arg2[%c0_43, %c0_44, %c0_45, %c2, %c0_46] : memref<8x1x1x4x8xf32, #tpu.memory_space<vmem>>, vector<8x1x1x1x8xf32>
    %44 = vector.shape_cast %43 : vector<8x1x1x1x8xf32> to vector<8x8xf32>
    %c0_47 = arith.constant 0 : index
    %c0_48 = arith.constant 0 : index
    %c0_49 = arith.constant 0 : index
    %c2_50 = arith.constant 2 : index
    %c0_51 = arith.constant 0 : index
    %45 = vector.load %arg3[%c0_47, %c0_48, %c0_49, %c2_50, %c0_51] : memref<8x1x1x4x8xf32, #tpu.memory_space<vmem>>, vector<8x1x1x1x8xf32>
    %46 = vector.shape_cast %45 : vector<8x1x1x1x8xf32> to vector<8x8xf32>
    %c0_52 = arith.constant 0 : index
    %c0_53 = arith.constant 0 : index
    %c0_54 = arith.constant 0 : index
    %c2_55 = arith.constant 2 : index
    %c0_56 = arith.constant 0 : index
    %47 = vector.load %arg4[%c0_52, %c0_53, %c0_54, %c2_55, %c0_56] : memref<8x1x1x4x8xf32, #tpu.memory_space<vmem>>, vector<8x1x1x1x8xf32>
    %48 = vector.shape_cast %47 : vector<8x1x1x1x8xf32> to vector<8x8xf32>
    %cst_57 = arith.constant dense<0.000000e+00> : vector<8x8xf32>
    %49 = tpu.matmul %44, %46, %cst_57 {dimension_numbers = #tpu.dot_dimension_numbers<[1], [1], [0], [0], [0, 0, 1, 0], [], []>} : vector<8x8xf32>, vector<8x8xf32>, vector<8x8xf32> -> vector<8x8xf32>
    %cst_58 = arith.constant dense<0xFF800000> : vector<8xf32>
    %50 = vector.multi_reduction <maximumf>, %49, %cst_58 [1] : vector<8x8xf32> to vector<8xf32>
    %51 = vector.shape_cast %50 : vector<8xf32> to vector<8x1xf32>
    %52 = vector.broadcast %51 : vector<8x1xf32> to vector<8x8xf32>
    %53 = arith.subf %49, %52 : vector<8x8xf32>
    %54 = math.exp %53 : vector<8x8xf32>
    %cst_59 = arith.constant dense<0.000000e+00> : vector<8xf32>
    %55 = vector.multi_reduction <add>, %54, %cst_59 [1] : vector<8x8xf32> to vector<8xf32>
    %56 = vector.shape_cast %55 : vector<8xf32> to vector<8x1xf32>
    %57 = tpu.reciprocal %56 : vector<8x1xf32> -> vector<8x1xf32>
    %58 = vector.broadcast %57 : vector<8x1xf32> to vector<8x8xf32>
    %59 = arith.mulf %54, %58 : vector<8x8xf32>
    %cst_60 = arith.constant dense<0.000000e+00> : vector<8x8xf32>
    %60 = tpu.matmul %59, %48, %cst_60 {dimension_numbers = #tpu.dot_dimension_numbers<[1], [0], [0], [1], [0, 0, 1, 1], [], []>} : vector<8x8xf32>, vector<8x8xf32>, vector<8x8xf32> -> vector<8x8xf32>
    %61 = arith.addf %39, %59 : vector<8x8xf32>
    %c0_61 = arith.constant 0 : index
    %c0_62 = arith.constant 0 : index
    %c2_63 = arith.constant 2 : index
    %c0_64 = arith.constant 0 : index
    %62 = vector.load %arg5[%c0_61, %c0_62, %c2_63, %c0_64] : memref<8x1x4x8xf32, #tpu.memory_space<vmem>>, vector<8x1x1x8xf32>
    %63 = vector.shape_cast %62 : vector<8x1x1x8xf32> to vector<8x8xf32>
    %64 = vector.shape_cast %60 : vector<8x8xf32> to vector<8x1x1x8xf32>
    tpu.vector_store %arg5[%c0_61, %c0_62, %c2_63, %c0_64], %64 {strides = array<i32>} : memref<8x1x4x8xf32, #tpu.memory_space<vmem>>, vector<8x1x1x8xf32>,
    %c0_65 = arith.constant 0 : index
    %c0_66 = arith.constant 0 : index
    %c0_67 = arith.constant 0 : index
    %c3 = arith.constant 3 : index
    %c0_68 = arith.constant 0 : index
    %65 = vector.load %arg2[%c0_65, %c0_66, %c0_67, %c3, %c0_68] : memref<8x1x1x4x8xf32, #tpu.memory_space<vmem>>, vector<8x1x1x1x8xf32>
    %66 = vector.shape_cast %65 : vector<8x1x1x1x8xf32> to vector<8x8xf32>
    %c0_69 = arith.constant 0 : index
    %c0_70 = arith.constant 0 : index
    %c0_71 = arith.constant 0 : index
    %c3_72 = arith.constant 3 : index
    %c0_73 = arith.constant 0 : index
    %67 = vector.load %arg3[%c0_69, %c0_70, %c0_71, %c3_72, %c0_73] : memref<8x1x1x4x8xf32, #tpu.memory_space<vmem>>, vector<8x1x1x1x8xf32>
    %68 = vector.shape_cast %67 : vector<8x1x1x1x8xf32> to vector<8x8xf32>
    %c0_74 = arith.constant 0 : index
    %c0_75 = arith.constant 0 : index
    %c0_76 = arith.constant 0 : index
    %c3_77 = arith.constant 3 : index
    %c0_78 = arith.constant 0 : index
    %69 = vector.load %arg4[%c0_74, %c0_75, %c0_76, %c3_77, %c0_78] : memref<8x1x1x4x8xf32, #tpu.memory_space<vmem>>, vector<8x1x1x1x8xf32>
    %70 = vector.shape_cast %69 : vector<8x1x1x1x8xf32> to vector<8x8xf32>
    %cst_79 = arith.constant dense<0.000000e+00> : vector<8x8xf32>
    %71 = tpu.matmul %66, %68, %cst_79 {dimension_numbers = #tpu.dot_dimension_numbers<[1], [1], [0], [0], [0, 0, 1, 0], [], []>} : vector<8x8xf32>, vector<8x8xf32>, vector<8x8xf32> -> vector<8x8xf32>
    %cst_80 = arith.constant dense<0xFF800000> : vector<8xf32>
    %72 = vector.multi_reduction <maximumf>, %71, %cst_80 [1] : vector<8x8xf32> to vector<8xf32>
    %73 = vector.shape_cast %72 : vector<8xf32> to vector<8x1xf32>
    %74 = vector.broadcast %73 : vector<8x1xf32> to vector<8x8xf32>
    %75 = arith.subf %71, %74 : vector<8x8xf32>
    %76 = math.exp %75 : vector<8x8xf32>
    %cst_81 = arith.constant dense<0.000000e+00> : vector<8xf32>
    %77 = vector.multi_reduction <add>, %76, %cst_81 [1] : vector<8x8xf32> to vector<8xf32>
    %78 = vector.shape_cast %77 : vector<8xf32> to vector<8x1xf32>
    %79 = tpu.reciprocal %78 : vector<8x1xf32> -> vector<8x1xf32>
    %80 = vector.broadcast %79 : vector<8x1xf32> to vector<8x8xf32>
    %81 = arith.mulf %76, %80 : vector<8x8xf32>
    %cst_82 = arith.constant dense<0.000000e+00> : vector<8x8xf32>
    %82 = tpu.matmul %81, %70, %cst_82 {dimension_numbers = #tpu.dot_dimension_numbers<[1], [0], [0], [1], [0, 0, 1, 1], [], []>} : vector<8x8xf32>, vector<8x8xf32>, vector<8x8xf32> -> vector<8x8xf32>
    %83 = arith.addf %61, %81 : vector<8x8xf32>
    %c0_83 = arith.constant 0 : index
    %c0_84 = arith.constant 0 : index
    %c3_85 = arith.constant 3 : index
    %c0_86 = arith.constant 0 : index
    %84 = vector.load %arg5[%c0_83, %c0_84, %c3_85, %c0_86] : memref<8x1x4x8xf32, #tpu.memory_space<vmem>>, vector<8x1x1x8xf32>
    %85 = vector.shape_cast %84 : vector<8x1x1x8xf32> to vector<8x8xf32>
    %86 = vector.shape_cast %82 : vector<8x8xf32> to vector<8x1x1x8xf32>
    tpu.vector_store %arg5[%c0_83, %c0_84, %c3_85, %c0_86], %86 {strides = array<i32>} : memref<8x1x4x8xf32, #tpu.memory_space<vmem>>, vector<8x1x1x8xf32>,
    %c0_i32 = arith.constant 0 : i32
    %87 = arith.cmpi eq, %arg1, %c0_i32 : i32
    %88 = arith.extui %87 : i1 to i32
    %c0_i32_87 = arith.constant 0 : i32
    %89 = arith.cmpi ne, %88, %c0_i32_87 : i32
    scf.if %89 {
      %cst_94 = arith.constant 0.000000e+00 : f32
      %96 = vector.broadcast %cst_94 : f32 to vector<8x8xf32>
      %c0_95 = arith.constant 0 : index
      %c0_96 = arith.constant 0 : index
      %97 = vector.load %arg7[%c0_95, %c0_96] : memref<8x8xf32, #tpu.memory_space<vmem>>, vector<8x8xf32>
      tpu.vector_store %arg7[%c0_95, %c0_96], %96 {strides = array<i32>} : memref<8x8xf32, #tpu.memory_space<vmem>>, vector<8x8xf32>,
    } else {
    }
    %c0_88 = arith.constant 0 : index
    %c0_89 = arith.constant 0 : index
    %90 = vector.load %arg7[%c0_88, %c0_89] : memref<8x8xf32, #tpu.memory_space<vmem>>, vector<8x8xf32>
    %91 = arith.addf %90, %83 : vector<8x8xf32>
    %c0_90 = arith.constant 0 : index
    %c0_91 = arith.constant 0 : index
    %92 = vector.load %arg7[%c0_90, %c0_91] : memref<8x8xf32, #tpu.memory_space<vmem>>, vector<8x8xf32>
    tpu.vector_store %arg7[%c0_90, %c0_91], %91 {strides = array<i32>} : memref<8x8xf32, #tpu.memory_space<vmem>>, vector<8x8xf32>,
    %c0_i32_92 = arith.constant 0 : i32
    %93 = arith.cmpi eq, %arg1, %c0_i32_92 : i32
    %94 = arith.extui %93 : i1 to i32
    %c0_i32_93 = arith.constant 0 : i32
    %95 = arith.cmpi ne, %94, %c0_i32_93 : i32
    scf.if %95 {
      %c0_94 = arith.constant 0 : index
      %c0_95 = arith.constant 0 : index
      %96 = vector.load %arg7[%c0_94, %c0_95] : memref<8x8xf32, #tpu.memory_space<vmem>>, vector<8x8xf32>
      %cst_96 = arith.constant 2.500000e-01 : f32
      %97 = vector.broadcast %cst_96 : f32 to vector<8x8xf32>
      %98 = arith.mulf %96, %97 : vector<8x8xf32>
      %c0_97 = arith.constant 0 : index
      %c0_98 = arith.constant 0 : index
      %c0_99 = arith.constant 0 : index
      %99 = vector.load %arg6[%c0_97, %c0_98, %c0_99] : memref<1x8x8xf32, #tpu.memory_space<vmem>>, vector<1x8x8xf32>
      %100 = vector.shape_cast %99 : vector<1x8x8xf32> to vector<8x8xf32>
      %101 = vector.shape_cast %98 : vector<8x8xf32> to vector<1x8x8xf32>
      tpu.vector_store %arg6[%c0_97, %c0_98, %c0_99], %101 {strides = array<i32>} : memref<1x8x8xf32, #tpu.memory_space<vmem>>, vector<1x8x8xf32>,
    } else {
    }
    return
  }
  func.func @transform_0(%arg0: i32, %arg1: i32) -> (i32, i32, i32, i32, i32) {
    %c0_i32 = arith.constant 0 : i32
    %c0_i32_0 = arith.constant 0 : i32
    %c0_i32_1 = arith.constant 0 : i32
    %c0_i32_2 = arith.constant 0 : i32
    return %c0_i32, %arg0, %c0_i32_0, %arg1, %c0_i32_1 : i32, i32, i32, i32, i32
  }
  func.func @transform_1(%arg0: i32, %arg1: i32) -> (i32, i32, i32, i32, i32) {
    %c0_i32 = arith.constant 0 : i32
    %c1_i32 = arith.constant 1 : i32
    %c0_i32_0 = arith.constant 0 : i32
    %c0_i32_1 = arith.constant 0 : i32
    return %c0_i32, %arg0, %c1_i32, %arg1, %c0_i32_0 : i32, i32, i32, i32, i32
  }
  func.func @transform_2(%arg0: i32, %arg1: i32) -> (i32, i32, i32, i32, i32) {
    %c0_i32 = arith.constant 0 : i32
    %c2_i32 = arith.constant 2 : i32
    %c0_i32_0 = arith.constant 0 : i32
    %c0_i32_1 = arith.constant 0 : i32
    return %c0_i32, %arg0, %c2_i32, %arg1, %c0_i32_0 : i32, i32, i32, i32, i32
  }
  func.func @transform_3(%arg0: i32, %arg1: i32) -> (i32, i32, i32, i32) {
    %c0_i32 = arith.constant 0 : i32
    %c0_i32_0 = arith.constant 0 : i32
    %c0_i32_1 = arith.constant 0 : i32
    return %c0_i32, %arg0, %arg1, %c0_i32_0 : i32, i32, i32, i32
  }
  func.func @transform_4(%arg0: i32, %arg1: i32) -> (i32, i32, i32) {
    %c0_i32 = arith.constant 0 : i32
    %c0_i32_0 = arith.constant 0 : i32
    %c0_i32_1 = arith.constant 0 : i32
    return %arg0, %c0_i32, %c0_i32_0 : i32, i32, i32
  }
}

module attributes {stable_mosaic.version = 11 : i64} {
  func.func @_gemm_kernel(%arg0: i32, %arg1: i32, %arg2: i32, %arg3: memref<16x32xf32, #tpu.memory_space<vmem>>, %arg4: memref<96x32xf32, #tpu.memory_space<vmem>>, %arg5: memref<1x96xf32, #tpu.memory_space<vmem>>, %arg6: memref<16x96xf32, #tpu.memory_space<vmem>>, %arg7: memref<16x96xf32, #tpu.memory_space<vmem>>) attributes {dimension_semantics = [#tpu.dimension_semantics<parallel>, #tpu.dimension_semantics<parallel>, #tpu.dimension_semantics<arbitrary>], iteration_bounds = array<i64: 1, 1, 1>, scalar_prefetch = 0 : i64, scratch_operands = 1 : i64, tpu.core_type = #tpu.core_type<tc>, window_params = [{transform_indices = @transform_0, window_bounds = array<i64: 16, 32>}, {transform_indices = @transform_1, window_bounds = array<i64: 96, 32>}, {transform_indices = @transform_2, window_bounds = array<i64: 1, 96>}, {transform_indices = @transform_3, window_bounds = array<i64: 16, 96>}]} {
    %c0_i32 = arith.constant 0 : i32
    %0 = arith.cmpi eq, %arg2, %c0_i32 : i32
    %1 = arith.extui %0 : i1 to i32
    %c0_i32_0 = arith.constant 0 : i32
    %2 = arith.cmpi ne, %1, %c0_i32_0 : i32
    scf.if %2 {
      %cst_10 = arith.constant 0.000000e+00 : f32
      %12 = vector.broadcast %cst_10 : f32 to vector<16x96xf32>
      %c0_11 = arith.constant 0 : index
      %c0_12 = arith.constant 0 : index
      %13 = vector.load %arg7[%c0_11, %c0_12] : memref<16x96xf32, #tpu.memory_space<vmem>>, vector<16x96xf32>
      tpu.vector_store %arg7[%c0_11, %c0_12], %12 {strides = array<i32>} : memref<16x96xf32, #tpu.memory_space<vmem>>, vector<16x96xf32>,
    } else {
    }
    %c0 = arith.constant 0 : index
    %c0_1 = arith.constant 0 : index
    %3 = vector.load %arg7[%c0, %c0_1] : memref<16x96xf32, #tpu.memory_space<vmem>>, vector<16x96xf32>
    %c0_2 = arith.constant 0 : index
    %c0_3 = arith.constant 0 : index
    %4 = vector.load %arg3[%c0_2, %c0_3] : memref<16x32xf32, #tpu.memory_space<vmem>>, vector<16x32xf32>
    %c0_4 = arith.constant 0 : index
    %c0_5 = arith.constant 0 : index
    %5 = vector.load %arg4[%c0_4, %c0_5] : memref<96x32xf32, #tpu.memory_space<vmem>>, vector<96x32xf32>
    %cst = arith.constant dense<0.000000e+00> : vector<16x96xf32>
    %6 = tpu.matmul %4, %5, %cst {dimension_numbers = #tpu.dot_dimension_numbers<[1], [1], [0], [0], [0, 0, 1, 0], [], []>} : vector<16x32xf32>, vector<96x32xf32>, vector<16x96xf32> -> vector<16x96xf32>
    %7 = arith.addf %3, %6 : vector<16x96xf32>
    %c0_6 = arith.constant 0 : index
    %c0_7 = arith.constant 0 : index
    %8 = vector.load %arg7[%c0_6, %c0_7] : memref<16x96xf32, #tpu.memory_space<vmem>>, vector<16x96xf32>
    tpu.vector_store %arg7[%c0_6, %c0_7], %7 {strides = array<i32>} : memref<16x96xf32, #tpu.memory_space<vmem>>, vector<16x96xf32>,
    %c0_i32_8 = arith.constant 0 : i32
    %9 = arith.cmpi eq, %arg2, %c0_i32_8 : i32
    %10 = arith.extui %9 : i1 to i32
    %c0_i32_9 = arith.constant 0 : i32
    %11 = arith.cmpi ne, %10, %c0_i32_9 : i32
    scf.if %11 {
      %c0_10 = arith.constant 0 : index
      %c0_11 = arith.constant 0 : index
      %12 = vector.load %arg7[%c0_10, %c0_11] : memref<16x96xf32, #tpu.memory_space<vmem>>, vector<16x96xf32>
      %c0_12 = arith.constant 0 : index
      %c0_13 = arith.constant 0 : index
      %13 = vector.load %arg5[%c0_12, %c0_13] : memref<1x96xf32, #tpu.memory_space<vmem>>, vector<1x96xf32>
      %14 = vector.broadcast %13 : vector<1x96xf32> to vector<16x96xf32>
      %15 = arith.addf %12, %14 : vector<16x96xf32>
      %c0_14 = arith.constant 0 : index
      %c0_15 = arith.constant 0 : index
      %16 = vector.load %arg6[%c0_14, %c0_15] : memref<16x96xf32, #tpu.memory_space<vmem>>, vector<16x96xf32>
      tpu.vector_store %arg6[%c0_14, %c0_15], %15 {strides = array<i32>} : memref<16x96xf32, #tpu.memory_space<vmem>>, vector<16x96xf32>,
    } else {
    }
    return
  }
  func.func @transform_0(%arg0: i32, %arg1: i32, %arg2: i32) -> (i32, i32) {
    %c0_i32 = arith.constant 0 : i32
    return %arg0, %arg2 : i32, i32
  }
  func.func @transform_1(%arg0: i32, %arg1: i32, %arg2: i32) -> (i32, i32) {
    %c0_i32 = arith.constant 0 : i32
    return %arg1, %arg2 : i32, i32
  }
  func.func @transform_2(%arg0: i32, %arg1: i32, %arg2: i32) -> (i32, i32) {
    %c0_i32 = arith.constant 0 : i32
    %c0_i32_0 = arith.constant 0 : i32
    return %c0_i32, %arg1 : i32, i32
  }
  func.func @transform_3(%arg0: i32, %arg1: i32, %arg2: i32) -> (i32, i32) {
    %c0_i32 = arith.constant 0 : i32
    return %arg0, %arg1 : i32, i32
  }
}

module attributes {stable_mosaic.version = 11 : i64} {
  func.func @_gemm_kernel(%arg0: i32, %arg1: i32, %arg2: i32, %arg3: memref<16x32xf32, #tpu.memory_space<vmem>>, %arg4: memref<32x32xf32, #tpu.memory_space<vmem>>, %arg5: memref<1x32xf32, #tpu.memory_space<vmem>>, %arg6: memref<16x32xf32, #tpu.memory_space<vmem>>, %arg7: memref<16x32xf32, #tpu.memory_space<vmem>>) attributes {dimension_semantics = [#tpu.dimension_semantics<parallel>, #tpu.dimension_semantics<parallel>, #tpu.dimension_semantics<arbitrary>], iteration_bounds = array<i64: 1, 1, 1>, scalar_prefetch = 0 : i64, scratch_operands = 1 : i64, tpu.core_type = #tpu.core_type<tc>, window_params = [{transform_indices = @transform_0, window_bounds = array<i64: 16, 32>}, {transform_indices = @transform_1, window_bounds = array<i64: 32, 32>}, {transform_indices = @transform_2, window_bounds = array<i64: 1, 32>}, {transform_indices = @transform_3, window_bounds = array<i64: 16, 32>}]} {
    %c0_i32 = arith.constant 0 : i32
    %0 = arith.cmpi eq, %arg2, %c0_i32 : i32
    %1 = arith.extui %0 : i1 to i32
    %c0_i32_0 = arith.constant 0 : i32
    %2 = arith.cmpi ne, %1, %c0_i32_0 : i32
    scf.if %2 {
      %cst_10 = arith.constant 0.000000e+00 : f32
      %12 = vector.broadcast %cst_10 : f32 to vector<16x32xf32>
      %c0_11 = arith.constant 0 : index
      %c0_12 = arith.constant 0 : index
      %13 = vector.load %arg7[%c0_11, %c0_12] : memref<16x32xf32, #tpu.memory_space<vmem>>, vector<16x32xf32>
      tpu.vector_store %arg7[%c0_11, %c0_12], %12 {strides = array<i32>} : memref<16x32xf32, #tpu.memory_space<vmem>>, vector<16x32xf32>,
    } else {
    }
    %c0 = arith.constant 0 : index
    %c0_1 = arith.constant 0 : index
    %3 = vector.load %arg7[%c0, %c0_1] : memref<16x32xf32, #tpu.memory_space<vmem>>, vector<16x32xf32>
    %c0_2 = arith.constant 0 : index
    %c0_3 = arith.constant 0 : index
    %4 = vector.load %arg3[%c0_2, %c0_3] : memref<16x32xf32, #tpu.memory_space<vmem>>, vector<16x32xf32>
    %c0_4 = arith.constant 0 : index
    %c0_5 = arith.constant 0 : index
    %5 = vector.load %arg4[%c0_4, %c0_5] : memref<32x32xf32, #tpu.memory_space<vmem>>, vector<32x32xf32>
    %cst = arith.constant dense<0.000000e+00> : vector<16x32xf32>
    %6 = tpu.matmul %4, %5, %cst {dimension_numbers = #tpu.dot_dimension_numbers<[1], [1], [0], [0], [0, 0, 1, 0], [], []>} : vector<16x32xf32>, vector<32x32xf32>, vector<16x32xf32> -> vector<16x32xf32>
    %7 = arith.addf %3, %6 : vector<16x32xf32>
    %c0_6 = arith.constant 0 : index
    %c0_7 = arith.constant 0 : index
    %8 = vector.load %arg7[%c0_6, %c0_7] : memref<16x32xf32, #tpu.memory_space<vmem>>, vector<16x32xf32>
    tpu.vector_store %arg7[%c0_6, %c0_7], %7 {strides = array<i32>} : memref<16x32xf32, #tpu.memory_space<vmem>>, vector<16x32xf32>,
    %c0_i32_8 = arith.constant 0 : i32
    %9 = arith.cmpi eq, %arg2, %c0_i32_8 : i32
    %10 = arith.extui %9 : i1 to i32
    %c0_i32_9 = arith.constant 0 : i32
    %11 = arith.cmpi ne, %10, %c0_i32_9 : i32
    scf.if %11 {
      %c0_10 = arith.constant 0 : index
      %c0_11 = arith.constant 0 : index
      %12 = vector.load %arg7[%c0_10, %c0_11] : memref<16x32xf32, #tpu.memory_space<vmem>>, vector<16x32xf32>
      %c0_12 = arith.constant 0 : index
      %c0_13 = arith.constant 0 : index
      %13 = vector.load %arg5[%c0_12, %c0_13] : memref<1x32xf32, #tpu.memory_space<vmem>>, vector<1x32xf32>
      %14 = vector.broadcast %13 : vector<1x32xf32> to vector<16x32xf32>
      %15 = arith.addf %12, %14 : vector<16x32xf32>
      %c0_14 = arith.constant 0 : index
      %c0_15 = arith.constant 0 : index
      %16 = vector.load %arg6[%c0_14, %c0_15] : memref<16x32xf32, #tpu.memory_space<vmem>>, vector<16x32xf32>
      tpu.vector_store %arg6[%c0_14, %c0_15], %15 {strides = array<i32>} : memref<16x32xf32, #tpu.memory_space<vmem>>, vector<16x32xf32>,
    } else {
    }
    return
  }
  func.func @transform_0(%arg0: i32, %arg1: i32, %arg2: i32) -> (i32, i32) {
    %c0_i32 = arith.constant 0 : i32
    return %arg0, %arg2 : i32, i32
  }
  func.func @transform_1(%arg0: i32, %arg1: i32, %arg2: i32) -> (i32, i32) {
    %c0_i32 = arith.constant 0 : i32
    return %arg1, %arg2 : i32, i32
  }
  func.func @transform_2(%arg0: i32, %arg1: i32, %arg2: i32) -> (i32, i32) {
    %c0_i32 = arith.constant 0 : i32
    %c0_i32_0 = arith.constant 0 : i32
    return %c0_i32, %arg1 : i32, i32
  }
  func.func @transform_3(%arg0: i32, %arg1: i32, %arg2: i32) -> (i32, i32) {
    %c0_i32 = arith.constant 0 : i32
    return %arg0, %arg1 : i32, i32
  }
}

</mosaic_0001>

<bundles_post_ra>
// kernel: mha_self_attention.3
= control target key start
LH: loop header
LB: loop body
LE: loop exit
PB: predicated region body
PF: predicated region fallthrough
CT: control target
= control target key end

     0   :  { %8 = vsyncpa [#allocation4], 0  ;;  %s556_s0 = inlined_call_operand.hbm [shape: f32[16,32], index: 0, kind: input, shape index: {}]   ;;  %s557_s1 = inlined_call_operand.hbm [shape: f32[96,32], index: 1, kind: input, shape index: {}]   ;;  %s558_s2 = inlined_call_operand.hbm [shape: f32[1,96], index: 2, kind: input, shape index: {}]   ;;  %s559_s3 = inlined_call_operand.hbm [shape: f32[16,96], index: 3, kind: output, shape index: {}]  }
   0x1   :  { %9 = vsyncpa [#allocation7], 0 }
   0x2   :  { %10 = vsyncpa [#allocation5], 0  ;;  %s427_s12 = smov [#allocation6]   ;;  %s428_s14 = smov [#allocation3]  }
   0x3   :  { %s28_s13 = sshll.u32 %s427_s12, 4  ;;  %s16_s15 = sshll.u32 %s428_s14, 4  ;;  %s29_s13 = int_to_ptr.vmem [resolvable:$true] %s28_s13  ;;  %s454_s15 = int_to_ptr.vmem [resolvable:$true] %s16_s15 }
   0x4   :  { %s333_s18 = scalar_lea.hbm %s557_s1, 1536 }
   0x5   :  { %p334_p0 = scmp.ne.s32.totalorder %s557_s1, %s333_s18  ;;  %p337_p1 = scmp.lt.u32.totalorder %s333_s18, %s557_s1 }
   0x7   :  { %p339_p2 = pnand %p337_p1, %p334_p0 }
   0x9   :  { %342 = shalt.err (!%p339_p2)
}
   0xa   :  { %s343_s23 = scalar_lea.vmem %s29_s13, 1536  ;;  %p348_p4 = scmp.lt.s32.totalorder %s29_s13, %s29_s13 }
   0xb   :  { %p344_p3 = scmp.ne.s32.totalorder %s29_s13, %s343_s23  ;;  %p349_p5 = scmp.lt.s32.totalorder %s343_s23, %s343_s23 }
   0xd   :  { %p350_p6 = por %p349_p5, %p348_p4 }
   0xf   :  { %p351_p7 = pnand %p350_p6, %p344_p3 }
  0x11   :  { %354 = shalt.err (!%p351_p7)
}
  0x12   :  { %s429_s24 = smov 128   ;;  %s430_s25 = smov 8  }
  0x13   :  { %34 = dma.hbm_to_vmem [thread:$0]  %s557_s1, 1536, %s29_s13, [#allocation7], %s429_s24, %s429_s24, %s430_s25  }
  0x14   :  { %s355_s30 = scalar_lea.hbm %s556_s0, 256 }
  0x15   :  { %p356_p8 = scmp.ne.s32.totalorder %s556_s0, %s355_s30  ;;  %p359_p9 = scmp.lt.u32.totalorder %s355_s30, %s556_s0 }
  0x17   :  { %p361_p10 = pnand %p359_p9, %p356_p8 }
  0x19   :  { %364 = shalt.err (!%p361_p10)
}
  0x1a   :  { %s365_s8 = scalar_lea.vmem %s454_s15, 256  ;;  %p370_p12 = scmp.lt.s32.totalorder %s454_s15, %s454_s15 }
  0x1b   :  { %p366_p11 = scmp.ne.s32.totalorder %s454_s15, %s365_s8  ;;  %p371_p13 = scmp.lt.s32.totalorder %s365_s8, %s365_s8 }
  0x1d   :  { %p372_p0 = por %p371_p13, %p370_p12 }
  0x1f   :  { %p373_p1 = pnand %p372_p0, %p366_p11 }
  0x21   :  { %376 = shalt.err (!%p373_p1)
}
  0x22   :  { %22 = dma.hbm_to_vmem [thread:$0]  %s556_s0, 256, %s454_s15, [#allocation4], %s429_s24, %s429_s24, %s430_s25  }
  0x23   :  { %s431_s10 = smov [#allocation8]   ;;  %s377_s14 = scalar_lea.hbm %s558_s2, 16 }
  0x24   :  { %s41_s11 = sshll.u32 %s431_s10, 4  ;;  %p378_p2 = scmp.ne.s32.totalorder %s558_s2, %s377_s14  ;;  %s42_s11 = int_to_ptr.vmem [resolvable:$true] %s41_s11 }
  0x25   :  { %p381_p3 = scmp.lt.u32.totalorder %s377_s14, %s558_s2 }
  0x27   :  { %p383_p4 = pnand %p381_p3, %p378_p2 }
  0x29   :  { %386 = shalt.err (!%p383_p4)
}
  0x2a   :  { %s387_s20 = scalar_lea.vmem %s42_s11, 16  ;;  %s391_s0 = scalar_lea.vmem %s42_s11, 32 }
  0x2b   :  { %p388_p5 = scmp.ne.s32.totalorder %s42_s11, %s387_s20  ;;  %p392_p6 = scmp.lt.s32.totalorder %s42_s11, %s42_s11 }
  0x2c   :  { %p393_p7 = scmp.lt.s32.totalorder %s391_s0, %s387_s20 }
  0x2e   :  { %p394_p8 = por %p393_p7, %p392_p6 }
  0x30   :  { %p395_p9 = pnand %p394_p8, %p388_p5 }
  0x32   :  { %398 = shalt.err (!%p395_p9)
}
  0x33   :  { %44 = dma.hbm_to_vmem [thread:$0]  %s558_s2, 16, %s42_s11, [#allocation7]  }
  0x34   :  { %421 = dma.done.wait [#allocation4], 256  }
  0x35   :  { %422 = vsyncadd [#allocation4], 4294967040 }
  0x36   :  { %423 = dma.done.wait [#allocation7], 1552  }
  0x37   :  { %424 = vsyncadd [#allocation7], 4294965744  ;;  %vm58_vm0 = vcmask 785408   ;;  %v432_v0 = vmov 0.0   ;;  %vm77_vm1 = vcmask 261120   ;;  %v65_v2 = vld [vmem:[#allocation6] sm:$0xff] }
  0x38   :  { %60 = vst.msk [vmem:[#allocation2 + $0x8] sm:$0xff] %vm58_vm0, %v432_v0  ;;  %59 = vst.msk [vmem:[#allocation2] sm:$0xff] %vm58_vm0, %v432_v0  ;;  %v66_v3 = vld [vmem:[#allocation6 + $0x8] sm:$0xff]  ;;  %v67_v4 = vld [vmem:[#allocation6 + $0x10] sm:$0xff]  ;;  %s433_s2 = smov [#allocation9]  }
  0x39   :  { %vm507_vm2 = vmpackc.low %vm77_vm1, %vm77_vm1  ;;  %v290_v5 = vpack.c.bf16 %v66_v3, %v65_v2  ;;  %v68_v6 = vld [vmem:[#allocation6 + $0x18] sm:$0xff]  ;;  %v63_v8 = vld [vmem:[#allocation3] sm:$0xff]  ;;  %s221_s22 = sshll.u32 %s433_s2, 4  ;;  %s222_s22 = int_to_ptr.vmem [resolvable:$true] %s221_s22 }
  0x3a   :  { %v296_v7 = vpack.c.bf16 %v68_v6, %v67_v4  ;;  %287 = vmatprep.mubr.msk.f32.mxu0 %vm77_vm1, %v63_v8  ;;  %v69_v9 = vld [vmem:[#allocation6 + $0x20] sm:$0xff]  ;;  %v70_v10 = vld [vmem:[#allocation6 + $0x28] sm:$0xff]  ;;  %v71_v12 = vld [vmem:[#allocation6 + $0x30] sm:$0xff]  ;;  %s399_s23 = scalar_lea.vmem %s222_s22, 256  ;;  %p404_p11 = scmp.lt.s32.totalorder %s222_s22, %s222_s22 }
  0x3b   :  { %292 = vmatprep.subr.msk.bf16.mxu0 %vm507_vm2, %v290_v5  ;;  %v302_v11 = vpack.c.bf16 %v70_v10, %v69_v9  ;;  %v72_v13 = vld [vmem:[#allocation6 + $0x38] sm:$0xff]  ;;  %v73_v15 = vld [vmem:[#allocation6 + $0x40] sm:$0xff]  ;;  %v74_v16 = vld [vmem:[#allocation6 + $0x48] sm:$0xff]  ;;  %p400_p10 = scmp.ne.s32.totalorder %s222_s22, %s399_s23  ;;  %p405_p12 = scmp.lt.s32.totalorder %s399_s23, %s399_s23 }
  0x3c   :  { %295 = vmatpush3.bf16.xpose.msk.msra.mxu0 %vm507_vm2, %v290_v5  ;;  %v308_v14 = vpack.c.bf16 %v72_v13, %v71_v12  ;;  %v314_v17 = vpack.c.bf16 %v74_v16, %v73_v15  ;;  %v75_v18 = vld [vmem:[#allocation6 + $0x50] sm:$0xff]  ;;  %v76_v19 = vld [vmem:[#allocation6 + $0x58] sm:$0xff]  ;;  %v248_v28 = vld [vmem:[#allocation8] ss:$0 sm:$0xff] }
  0x3d   :  { %298 = vmatprep.subr.msk.bf16.mxu0 %vm507_vm2, %v296_v7  ;;  %v320_v20 = vpack.c.bf16 %v76_v19, %v75_v18  ;;  %v64_v21 = vld [vmem:[#allocation3 + $0x8] sm:$0xff]  ;;  %p406_p13 = por %p405_p12, %p404_p11 }
  0x3f   :  { %v62_v22 = vld [vmem:[#allocation2 + $0x8] sm:$0xff]  ;;  %v61_v23 = vld [vmem:[#allocation2] sm:$0xff]  ;;  %p407_p0 = pnand %p406_p13, %p400_p10 }
  0x44   :  { %301 = vmatpush3.bf16.xpose.msk.msra.mxu0 %vm507_vm2, %v296_v7 }
  0x45   :  { %304 = vmatprep.subr.msk.bf16.mxu0 %vm507_vm2, %v302_v11 }
  0x4c   :  { %307 = vmatpush3.bf16.xpose.msk.msra.mxu0 %vm507_vm2, %v302_v11 }
  0x4d   :  { %310 = vmatprep.subr.msk.bf16.mxu0 %vm507_vm2, %v308_v14 }
  0x54   :  { %313 = vmatpush3.bf16.xpose.msk.msra.mxu0 %vm507_vm2, %v308_v14 }
  0x55   :  { %316 = vmatprep.subr.msk.bf16.mxu0 %vm507_vm2, %v314_v17 }
  0x5c   :  { %319 = vmatpush3.bf16.xpose.msk.msra.mxu0 %vm507_vm2, %v314_v17 }
  0x5d   :  { %322 = vmatprep.subr.msk.bf16.mxu0 %vm507_vm2, %v320_v20 }
  0x64   :  { %325 = vmatpush3.bf16.xpose.msk.msra.mxu0 %vm507_vm2, %v320_v20 }
  0x6b   :  { %288 = vmatmul.mubr.msk.f32.vlgmr.msra.gmra.mrb[0].mxu0 %vm77_vm1, %v64_v21 }
 0x13e   :  { %v289_v24 = vpop.f32.mrb[0].mxu0 }
 0x13f   :  { %v196_v25 = vadd.f32 %v289_v24, %v62_v22  ;;  %v186_v26 = vpop.f32.mrb[1].mxu0 }
 0x140   :  { %v195_v27 = vadd.f32 %v186_v26, %v61_v23 }
 0x141   :  { %199 = vst.msk [vmem:[#allocation2 + $0x8] sm:$0xff] %vm58_vm0, %v196_v25 }
 0x142   :  { %198 = vst.msk [vmem:[#allocation2] sm:$0xff] %vm58_vm0, %v195_v27 }
 0x148   :  { %v204_v29 = vld [vmem:[#allocation2 + $0x8] sm:$0xff] }
 0x149   :  { %v203_v30 = vld [vmem:[#allocation2] sm:$0xff]  ;;  %v213_v31 = vadd.f32 %v248_v28, %v204_v29 }
 0x14a   :  { %v212_v32 = vadd.f32 %v248_v28, %v203_v30 }
 0x14b   :  { %215 = vst.msk [vmem:[#allocation9 + $0x8] sm:$0xff] %vm58_vm0, %v213_v31 }
 0x14c   :  { %214 = vst.msk [vmem:[#allocation9] sm:$0xff] %vm58_vm0, %v212_v32 }
 0x14d   :  { %410 = shalt.err (!%p407_p0)
}
 0x14e   :  { %s411_s28 = scalar_lea.hbm %s559_s3, 256 }
 0x14f   :  { %p412_p1 = scmp.ne.s32.totalorder %s559_s3, %s411_s28  ;;  %p415_p2 = scmp.lt.u32.totalorder %s411_s28, %s559_s3 }
 0x151   :  { %p417_p3 = pnand %p415_p2, %p412_p1 }
 0x153   :  { %420 = shalt.err (!%p417_p3)
}
 0x154   :  { %227 = dma.vmem_to_hbm [thread:$0]  %s222_s22, 256, %s559_s3, [#allocation5], %s429_s24, %s429_s24, %s430_s25  }
 0x155   :  { %425 = dma.done.wait [#allocation5], 256  }
 0x156   :  { %426 = vsyncadd [#allocation5], 4294967040 }
 0x157   :  { %231 = vsyncpa [#allocation4], 1 }
 0x158   :  { %232 = vsyncpa [#allocation7], 1 }
 0x159   :  { %233 = vsyncpa [#allocation5], 1 }

// kernel: mha_self_attention.5
= control target key start
LH: loop header
LB: loop body
LE: loop exit
PB: predicated region body
PF: predicated region fallthrough
CT: control target
= control target key end

     0   :  { %8 = vsyncpa [#allocation4], 0  ;;  %s439_s0 = inlined_call_operand.hbm [shape: f32[16,32], index: 0, kind: input, shape index: {}]   ;;  %s440_s1 = inlined_call_operand.hbm [shape: f32[32,32], index: 1, kind: input, shape index: {}]   ;;  %s441_s2 = inlined_call_operand.hbm [shape: f32[1,32], index: 2, kind: input, shape index: {}]   ;;  %s442_s3 = inlined_call_operand.hbm [shape: f32[16,32], index: 3, kind: output, shape index: {}]  }
   0x1   :  { %9 = vsyncpa [#allocation7], 0 }
   0x2   :  { %10 = vsyncpa [#allocation5], 0  ;;  %s338_s12 = smov [#allocation6]   ;;  %s339_s14 = smov [#allocation3]  }
   0x3   :  { %s28_s13 = sshll.u32 %s338_s12, 4  ;;  %s16_s15 = sshll.u32 %s339_s14, 4  ;;  %s29_s13 = int_to_ptr.vmem [resolvable:$true] %s28_s13  ;;  %s365_s15 = int_to_ptr.vmem [resolvable:$true] %s16_s15 }
   0x4   :  { %s244_s18 = scalar_lea.hbm %s440_s1, 512 }
   0x5   :  { %p245_p0 = scmp.ne.s32.totalorder %s440_s1, %s244_s18  ;;  %p248_p1 = scmp.lt.u32.totalorder %s244_s18, %s440_s1 }
   0x7   :  { %p250_p2 = pnand %p248_p1, %p245_p0 }
   0x9   :  { %253 = shalt.err (!%p250_p2)
}
   0xa   :  { %s254_s23 = scalar_lea.vmem %s29_s13, 512  ;;  %p259_p4 = scmp.lt.s32.totalorder %s29_s13, %s29_s13 }
   0xb   :  { %p255_p3 = scmp.ne.s32.totalorder %s29_s13, %s254_s23  ;;  %p260_p5 = scmp.lt.s32.totalorder %s254_s23, %s254_s23 }
   0xd   :  { %p261_p6 = por %p260_p5, %p259_p4 }
   0xf   :  { %p262_p7 = pnand %p261_p6, %p255_p3 }
  0x11   :  { %265 = shalt.err (!%p262_p7)
}
  0x12   :  { %s340_s24 = smov 128   ;;  %s341_s25 = smov 8  }
  0x13   :  { %34 = dma.hbm_to_vmem [thread:$0]  %s440_s1, 512, %s29_s13, [#allocation7], %s340_s24, %s340_s24, %s341_s25  }
  0x14   :  { %s266_s30 = scalar_lea.hbm %s439_s0, 256 }
  0x15   :  { %p267_p8 = scmp.ne.s32.totalorder %s439_s0, %s266_s30  ;;  %p270_p9 = scmp.lt.u32.totalorder %s266_s30, %s439_s0 }
  0x17   :  { %p272_p10 = pnand %p270_p9, %p267_p8 }
  0x19   :  { %275 = shalt.err (!%p272_p10)
}
  0x1a   :  { %s276_s8 = scalar_lea.vmem %s365_s15, 256  ;;  %p281_p12 = scmp.lt.s32.totalorder %s365_s15, %s365_s15 }
  0x1b   :  { %p277_p11 = scmp.ne.s32.totalorder %s365_s15, %s276_s8  ;;  %p282_p13 = scmp.lt.s32.totalorder %s276_s8, %s276_s8 }
  0x1d   :  { %p283_p0 = por %p282_p13, %p281_p12 }
  0x1f   :  { %p284_p1 = pnand %p283_p0, %p277_p11 }
  0x21   :  { %287 = shalt.err (!%p284_p1)
}
  0x22   :  { %22 = dma.hbm_to_vmem [thread:$0]  %s439_s0, 256, %s365_s15, [#allocation4], %s340_s24, %s340_s24, %s341_s25  }
  0x23   :  { %s342_s10 = smov [#allocation8]   ;;  %s288_s14 = scalar_lea.hbm %s441_s2, 16 }
  0x24   :  { %s41_s11 = sshll.u32 %s342_s10, 4  ;;  %p289_p2 = scmp.ne.s32.totalorder %s441_s2, %s288_s14  ;;  %s42_s11 = int_to_ptr.vmem [resolvable:$true] %s41_s11 }
  0x25   :  { %p292_p3 = scmp.lt.u32.totalorder %s288_s14, %s441_s2 }
  0x27   :  { %p294_p4 = pnand %p292_p3, %p289_p2 }
  0x29   :  { %297 = shalt.err (!%p294_p4)
}
  0x2a   :  { %s298_s20 = scalar_lea.vmem %s42_s11, 16  ;;  %s302_s0 = scalar_lea.vmem %s42_s11, 32 }
  0x2b   :  { %p299_p5 = scmp.ne.s32.totalorder %s42_s11, %s298_s20  ;;  %p303_p6 = scmp.lt.s32.totalorder %s42_s11, %s42_s11 }
  0x2c   :  { %p304_p7 = scmp.lt.s32.totalorder %s302_s0, %s298_s20 }
  0x2e   :  { %p305_p8 = por %p304_p7, %p303_p6 }
  0x30   :  { %p306_p9 = pnand %p305_p8, %p299_p5 }
  0x32   :  { %309 = shalt.err (!%p306_p9)
}
  0x33   :  { %44 = dma.hbm_to_vmem [thread:$0]  %s441_s2, 16, %s42_s11, [#allocation7]  }
  0x34   :  { %332 = dma.done.wait [#allocation4], 256  }
  0x35   :  { %333 = vsyncadd [#allocation4], 4294967040 }
  0x36   :  { %334 = dma.done.wait [#allocation7], 528  }
  0x37   :  { %335 = vsyncadd [#allocation7], 4294966768  ;;  %vm58_vm0 = vcmask 261120   ;;  %v343_v0 = vmov 0.0   ;;  %v65_v1 = vld [vmem:[#allocation6] sm:$0xff]  ;;  %v66_v2 = vld [vmem:[#allocation6 + $0x8] sm:$0xff] }
  0x38   :  { %60 = vst.msk [vmem:[#allocation2 + $0x8] sm:$0xff] %vm58_vm0, %v343_v0  ;;  %59 = vst.msk [vmem:[#allocation2] sm:$0xff] %vm58_vm0, %v343_v0  ;;  %v67_v3 = vld [vmem:[#allocation6 + $0x10] sm:$0xff]  ;;  %v225_v4 = vpack.c.bf16 %v66_v2, %v65_v1  ;;  %v68_v5 = vld [vmem:[#allocation6 + $0x18] sm:$0xff]  ;;  %s344_s2 = smov [#allocation9]  }
  0x39   :  { %vm226_vm1 = vmpackc.low %vm58_vm0, %vm58_vm0  ;;  %v63_v6 = vld [vmem:[#allocation3] sm:$0xff]  ;;  %v231_v7 = vpack.c.bf16 %v68_v5, %v67_v3  ;;  %v64_v8 = vld [vmem:[#allocation3 + $0x8] sm:$0xff]  ;;  %s188_s22 = sshll.u32 %s344_s2, 4  ;;  %s189_s22 = int_to_ptr.vmem [resolvable:$true] %s188_s22 }
  0x3a   :  { %222 = vmatprep.mubr.msk.f32.mxu0 %vm58_vm0, %v63_v6  ;;  %227 = vmatprep.subr.msk.bf16.mxu0 %vm226_vm1, %v225_v4  ;;  %v207_v15 = vld [vmem:[#allocation8] ss:$0 sm:$0xff]  ;;  %s310_s23 = scalar_lea.vmem %s189_s22, 256  ;;  %p315_p11 = scmp.lt.s32.totalorder %s189_s22, %s189_s22 }
  0x3b   :  { %230 = vmatpush3.bf16.xpose.msk.msra.mxu0 %vm226_vm1, %v225_v4  ;;  %p311_p10 = scmp.ne.s32.totalorder %s189_s22, %s310_s23  ;;  %p316_p12 = scmp.lt.s32.totalorder %s310_s23, %s310_s23 }
  0x3c   :  { %233 = vmatprep.subr.msk.bf16.mxu0 %vm226_vm1, %v231_v7 }
  0x3d   :  { %p317_p13 = por %p316_p12, %p315_p11 }
  0x3f   :  { %v62_v9 = vld [vmem:[#allocation2 + $0x8] sm:$0xff]  ;;  %v61_v10 = vld [vmem:[#allocation2] sm:$0xff]  ;;  %p318_p0 = pnand %p317_p13, %p311_p10 }
  0x43   :  { %236 = vmatpush3.bf16.xpose.msk.msra.mxu0 %vm226_vm1, %v231_v7 }
  0x4a   :  { %223 = vmatmul.mubr.msk.f32.vlgmr.msra.gmra.mrb[0].mxu0 %vm58_vm0, %v64_v8 }
 0x11d   :  { %v224_v11 = vpop.f32.mrb[0].mxu0 }
 0x11e   :  { %v164_v12 = vadd.f32 %v224_v11, %v62_v9  ;;  %v154_v13 = vpop.f32.mrb[1].mxu0 }
 0x11f   :  { %v163_v14 = vadd.f32 %v154_v13, %v61_v10 }
 0x120   :  { %166 = vst.msk [vmem:[#allocation2 + $0x8] sm:$0xff] %vm58_vm0, %v164_v12 }
 0x121   :  { %165 = vst.msk [vmem:[#allocation2] sm:$0xff] %vm58_vm0, %v163_v14 }
 0x127   :  { %v171_v16 = vld [vmem:[#allocation2 + $0x8] sm:$0xff] }
 0x128   :  { %v170_v17 = vld [vmem:[#allocation2] sm:$0xff]  ;;  %v180_v18 = vadd.f32 %v207_v15, %v171_v16 }
 0x129   :  { %v179_v19 = vadd.f32 %v207_v15, %v170_v17 }
 0x12a   :  { %182 = vst.msk [vmem:[#allocation9 + $0x8] sm:$0xff] %vm58_vm0, %v180_v18 }
 0x12b   :  { %181 = vst.msk [vmem:[#allocation9] sm:$0xff] %vm58_vm0, %v179_v19 }
 0x12c   :  { %321 = shalt.err (!%p318_p0)
}
 0x12d   :  { %s322_s28 = scalar_lea.hbm %s442_s3, 256 }
 0x12e   :  { %p323_p1 = scmp.ne.s32.totalorder %s442_s3, %s322_s28  ;;  %p326_p2 = scmp.lt.u32.totalorder %s322_s28, %s442_s3 }
 0x130   :  { %p328_p3 = pnand %p326_p2, %p323_p1 }
 0x132   :  { %331 = shalt.err (!%p328_p3)
}
 0x133   :  { %194 = dma.vmem_to_hbm [thread:$0]  %s189_s22, 256, %s442_s3, [#allocation5], %s340_s24, %s340_s24, %s341_s25  }
 0x134   :  { %336 = dma.done.wait [#allocation5], 256  }
 0x135   :  { %337 = vsyncadd [#allocation5], 4294967040 }
 0x136   :  { %198 = vsyncpa [#allocation4], 1 }
 0x137   :  { %199 = vsyncpa [#allocation7], 1 }
 0x138   :  { %200 = vsyncpa [#allocation5], 1 }

// kernel: mha_self_attention.4
= control target key start
LH: loop header
LB: loop body
LE: loop exit
PB: predicated region body
PF: predicated region fallthrough
CT: control target
= control target key end

     0   :  { %s2916_s0 = inlined_call_operand.hbm [shape: f32[8,2,3,4,8], index: 0, kind: input, shape index: {}, may-alias: {0,1,2}]   ;;  %s2917_s1 = inlined_call_operand.hbm [shape: f32[8,2,3,4,8], index: 1, kind: input, shape index: {}, may-alias: {0,1,2}]   ;;  %s2918_s2 = inlined_call_operand.hbm [shape: f32[8,2,3,4,8], index: 2, kind: input, shape index: {}, may-alias: {0,1,2}]   ;;  %s2919_s3 = inlined_call_operand.hbm [shape: f32[8,2,4,8], index: 3, kind: output, shape index: {0}]   ;;  %s2920_s4 = inlined_call_operand.hbm [shape: f32[2,8,8], index: 4, kind: output, shape index: {1}]  }
   0x1   :  { %2934 = sst [smem:[#allocation20_spill]] %s2916_s0 }
   0x2   :  { %2935 = sst [smem:[#allocation21_spill]] %s2917_s1 }
   0x3   :  { %10 = vsyncpa [#allocation4], 0 }
   0x4   :  { %12 = vsyncpa [#allocation4 + $0x1], 0 }
   0x5   :  { %13 = vsyncpa [#allocation7], 0 }
   0x6   :  { %15 = vsyncpa [#allocation7 + $0x1], 0 }
   0x7   :  { %16 = vsyncpa [#allocation5], 0 }
   0x8   :  { %18 = vsyncpa [#allocation5 + $0x1], 0 }
   0x9   :  { %19 = vsyncpa [#allocation11], 0 }
   0xa   :  { %21 = vsyncpa [#allocation11 + $0x1], 0  ;;  %s2256_s15 = smov 0   ;;  %s2258_s16 = smov 0  }
   0xb   :  { %s2260_s17 = smov 0   ;;  %s2262_s18 = smov 0  }
   0xc   :  { %s2264_s19 = smov 0   ;;  %s2266_s20 = smov 0  }
   0xd LB: > { %2936 = sst [smem:[#allocation16_spill]] %s2211_s19  ;;  %s2287_s21 = sadd.s32 4294967295, %s2215_s20   ;;  %s2215_s20 = sphi %s2266_s20, %s27_s20   ;;  %s2211_s19 = sphi %s2264_s19, %s2961_s19   ;;  %s2207_s18 = sphi %s2262_s18, %s2960_s18   ;;  %s2203_s17 = sphi %s2260_s17, %s2964_s17   ;;  %s2199_s16 = sphi %s2258_s16, %s2963_s16   ;;  %s2195_s15 = sphi %s2256_s15, %s2962_s15  }
   0xe   : > { %2937 = sst [smem:[#allocation17_spill]] %s2215_s20  ;;  %s1813_s22 = sadd.s32 4294967294, %s2215_s20  }
   0xf   : > { %s39_s23 = sadd.s32 1, %s2211_s19  ;;  %s48_s24 = sadd.s32 1, %s2203_s17 }
  0x10   : > { %p41_p0 = scmp.ge.s32.totalorder %s39_s23, 2  ;;  %p55_p1 = scmp.ne.s32.totalorder %s2203_s17, %s2199_s16 }
  0x11   : > { %p56_p2 = scmp.eq.s32.totalorder %s2215_s20, 0  ;;  %p61_p3 = scmp.ne.s32.totalorder %s2199_s16, %s2195_s15 }
  0x12   : > { %s2966_s23 = smov (%p41_p0, %s39_s23), 0  ;;  %p62_p5 = scmp.eq.s32.totalorder %s2287_s21, 0 }
  0x13   : > { %2938 = sst [smem:[#allocation18_spill]] %s2966_s23  ;;  %p2299_p4 = por %p56_p2, %p55_p1 }
  0x14   : > { %s43_s26 = ssub.s32 %s2211_s19, %s2966_s23  ;;  %p143_p6 = scmp.eq.s32.totalorder %s2287_s21, 1 }
  0x15   : > { %p46_p7 = scmp.eq.s32.totalorder %s43_s26, 0  ;;  %p2307_p8 = por %p62_p5, %p61_p3 }
  0x16   : > { %p2311_p9 = por %p143_p6, %p55_p1  ;;  %p149_p10 = scmp.eq.s32.totalorder %s1813_s22, 1 }
  0x17   : > { %s2940_s27 = scalar_select %p2307_p8, 1, 0 }
  0x18   : > { %s2941_s28 = scalar_select %p2311_p9, 1, 0 }
  0x19   : > { %s2316_s29 = scalar_select %p46_p7, %s2203_s17, %s48_s24  }
  0x1a   : > { %p2318_p11 = por %p149_p10, %p61_p3  ;;  %p1930_p13 = scmp.lt.s32.totalorder %s2215_s20, 2 }
  0x1b   : > { %2942 = sst [smem:[#allocation19_spill]] %s2316_s29  ;;  %s2921_s5 = sand.u32 1, %s2203_s17  }
  0x1c   : > { %s2943_s30 = scalar_select %p2318_p11, 1, 0 }
  0x1d   : > { %s2327_s6 = sshll.u32 %s2921_s5, 5  ;;  %s2330_s7 = smul.u32 192, %s2211_s19 }
  0x1e   : > { %p2334_p0 = pnand %p1930_p13, %p2299_p4  ;;  %s217_s9 = sand.u32 1, %s2215_s20  }
  0x1f   : > { %s2945_s1 = sld [smem:[#allocation21_spill]]  ;;  %s221_s13 = scalar_lea.vmem [#allocation6], %s2327_s6 }
  0x20   : > { %s230_s14 = sshll.u32 %s221_s13, 4  ;;  %s2348_s24 = scalar_lea.sflag [#allocation7], %s217_s9  ;;  %s2346_s14 = int_to_ptr.vmem [resolvable:$true] %s230_s14 }
  0x21   : > { %p2353_p2 = pneg %p2334_p0 }
  0x25   : > { %s1702_s12 = scalar_lea.hbm %s2945_s1, %s2330_s7  ;;  %s2010_s13 = scalar_lea.hbm %s2945_s1, 3072 }
  0x26   : > { %s2344_s22 = scalar_lea.hbm %s1702_s12, 64  ;;  %s2035_s25 = scalar_lea.hbm %s1702_s12, 576 }
  0x27   : > { %p2006_p1 = scmp.ne.s32.totalorder %s2344_s22, %s2035_s25  ;;  %p2011_p5 = scmp.lt.u32.totalorder %s2344_s22, %s2945_s1 }
  0x28   : > { %p2012_p6 = scmp.lt.u32.totalorder %s2010_s13, %s2035_s25  ;;  %p2014_p10 = scmp.lt.u32.totalorder %s2035_s25, %s2344_s22 }
  0x29   : > { %p2008_p3 = pnand %p2353_p2, %p2006_p1 }
  0x2a   : > { %p2013_p7 = por %p2012_p6, %p2011_p5 }
  0x2b   : > { %p2009_p4 = pneg %p2008_p3 }
  0x2c   : > { %p2015_p13 = por %p2014_p10, %p2013_p7 }
  0x2e   : > { %p2016_p12 = pnand %p2015_p13, %p2009_p4 }
  0x30   : > { %2019 = shalt.err (!%p2016_p12)
}
  0x31   : > { %s2020_s9 = scalar_lea.vmem %s2346_s14, 512  ;;  %s2217_s12 = smov [#allocation6]  }
  0x32   : > { %p2021_p1 = scmp.ne.s32.totalorder %s2346_s14, %s2020_s9  ;;  %s2025_s10 = sshll.u32 %s2217_s12, 4  ;;  %s2026_s10 = int_to_ptr.vmem [resolvable:$false] %s2025_s10 }
  0x33   : > { %s2027_s23 = scalar_lea.vmem %s2026_s10, 1024  ;;  %p2028_p9 = scmp.lt.s32.totalorder %s2346_s14, %s2026_s10 }
  0x34   : > { %p2023_p3 = pnand %p2021_p1, %p2353_p2  ;;  %p2029_p8 = scmp.lt.s32.totalorder %s2027_s23, %s2020_s9 }
  0x36   : > { %p2024_p11 = pneg %p2023_p3  ;;  %p2030_p5 = por %p2029_p8, %p2028_p9 }
  0x38   : > { %p2031_p6 = pnand %p2030_p5, %p2024_p11 }
  0x3a   : > { %2034 = shalt.err (!%p2031_p6)
}
  0x3b   : > { %s2925_s5 = smov 384   ;;  %s2927_s25 = smov 64  }
  0x3c   : > { %s2929_s11 = smov 4   ;;  %p1822_p8 = scmp.ge.s32.totalorder %s2215_s20, 1 }
  0x3d   : > { %1919 = dma.hbm_to_vmem [thread:$0]  (!%p2334_p0), %s2344_s22, 512, %s2346_s14, %s2348_s24, %s2925_s5, %s2927_s25, %s2929_s11  }
  0x3e   : > { %p261_p9 = scmp.lt.s32.totalorder %s2215_s20, 3  ;;  %s2948_s0 = sld [smem:[#allocation20_spill]] }
  0x3f   : > { %s199_s23 = scalar_lea.vmem [#allocation3], %s2327_s6  ;;  %s2399_s5 = scalar_lea.hbm %s2918_s2, %s2330_s7 }
  0x40   : > { %p2382_p11 = pnand %p1822_p8, %p261_p9  ;;  %s207_s1 = sshll.u32 %s199_s23, 4  ;;  %s2393_s1 = int_to_ptr.vmem [resolvable:$true] %s207_s1 }
  0x41   : > { %s2949_s25 = sand.u32 1, %s2203_s17  }
  0x42   : > { %s2947_s13 = scalar_select %p2382_p11, 1, 0 }
  0x43   : > { %s2403_s11 = scalar_lea.sflag [#allocation4], %s2949_s25 }
  0x44   : > { %s2390_s10 = scalar_lea.hbm %s2948_s0, %s2330_s7  ;;  %s2041_s29 = scalar_lea.hbm %s2948_s0, 3072 }
  0x45   : > { %s2036_s19 = scalar_lea.hbm %s2390_s10, 512  ;;  %p2042_p10 = scmp.lt.u32.totalorder %s2390_s10, %s2948_s0 }
  0x46   : > { %p2037_p12 = scmp.ne.s32.totalorder %s2390_s10, %s2036_s19  ;;  %p2043_p13 = scmp.lt.u32.totalorder %s2041_s29, %s2036_s19 }
  0x47   : > { %p2045_p3 = scmp.lt.u32.totalorder %s2036_s19, %s2390_s10 }
  0x48   : > { %p2039_p4 = pnand %p2037_p12, %p2353_p2  ;;  %p2044_p1 = por %p2043_p13, %p2042_p10 }
  0x4a   : > { %p2040_p7 = pneg %p2039_p4  ;;  %p2046_p5 = por %p2045_p3, %p2044_p1 }
  0x4c   : > { %p2047_p6 = pnand %p2046_p5, %p2040_p7 }
  0x4e   : > { %2050 = shalt.err (!%p2047_p6)
}
  0x4f   : > { %s2051_s7 = scalar_lea.vmem %s2393_s1, 512  ;;  %s2221_s25 = smov [#allocation3]  }
  0x50   : > { %p2052_p8 = scmp.ne.s32.totalorder %s2393_s1, %s2051_s7  ;;  %s2056_s14 = sshll.u32 %s2221_s25, 4  ;;  %s2057_s14 = int_to_ptr.vmem [resolvable:$false] %s2056_s14 }
  0x51   : > { %s2058_s20 = scalar_lea.vmem %s2057_s14, 1024  ;;  %p2059_p4 = scmp.lt.s32.totalorder %s2393_s1, %s2057_s14 }
  0x52   : > { %p2054_p9 = pnand %p2052_p8, %p2353_p2  ;;  %p2060_p11 = scmp.lt.s32.totalorder %s2058_s20, %s2051_s7 }
  0x54   : > { %p2055_p12 = pneg %p2054_p9  ;;  %p2061_p10 = por %p2060_p11, %p2059_p4 }
  0x56   : > { %p2062_p13 = pnand %p2061_p10, %p2055_p12 }
  0x58   : > { %2065 = shalt.err (!%p2062_p13)
}
  0x59   : > { %s2950_s19 = smov 4   ;;  %s2951_s29 = smov 64  }
  0x5a   : > { %s2952_s22 = smov 384   ;;  %s2431_s9 = scalar_lea.hbm %s2399_s5, 128 }
  0x5b   : > { %1916 = dma.hbm_to_vmem [thread:$0]  (!%p2334_p0), %s2390_s10, 512, %s2393_s1, %s2403_s11, %s2952_s22, %s2951_s29, %s2950_s19  }
  0x5c   : > { %s244_s12 = scalar_lea.vmem [#allocation8], %s2327_s6  ;;  %s2096_s7 = scalar_lea.hbm %s2399_s5, 640 }
  0x5d   : > { %s253_s23 = sshll.u32 %s244_s12, 4  ;;  %p2067_p11 = scmp.ne.s32.totalorder %s2431_s9, %s2096_s7  ;;  %s2434_s23 = int_to_ptr.vmem [resolvable:$true] %s253_s23 }
  0x5e   : > { %s2071_s20 = scalar_lea.hbm %s2918_s2, 3072  ;;  %p2072_p3 = scmp.lt.u32.totalorder %s2431_s9, %s2918_s2 }
  0x5f   : > { %p2069_p7 = pnand %p2067_p11, %p2353_p2  ;;  %p2073_p5 = scmp.lt.u32.totalorder %s2071_s20, %s2096_s7 }
  0x60   : > { %p2075_p8 = scmp.lt.u32.totalorder %s2096_s7, %s2431_s9 }
  0x61   : > { %p2070_p1 = pneg %p2069_p7  ;;  %p2074_p6 = por %p2073_p5, %p2072_p3 }
  0x63   : > { %p2076_p9 = por %p2075_p8, %p2074_p6 }
  0x65   : > { %p2077_p12 = pnand %p2076_p9, %p2070_p1 }
  0x67   : > { %2080 = shalt.err (!%p2077_p12)
}
  0x68   : > { %s2081_s6 = scalar_lea.vmem %s2434_s23, 512  ;;  %s2222_s5 = smov [#allocation8]  }
  0x69   : > { %p2082_p4 = scmp.ne.s32.totalorder %s2434_s23, %s2081_s6  ;;  %s2086_s11 = sshll.u32 %s2222_s5, 4  ;;  %s2087_s11 = int_to_ptr.vmem [resolvable:$false] %s2086_s11 }
  0x6a   : > { %s2088_s0 = scalar_lea.vmem %s2087_s11, 1024  ;;  %p2089_p11 = scmp.lt.s32.totalorder %s2434_s23, %s2087_s11 }
  0x6b   : > { %p2084_p10 = pnand %p2082_p4, %p2353_p2  ;;  %p2090_p7 = scmp.lt.s32.totalorder %s2088_s0, %s2081_s6 }
  0x6d   : > { %p2085_p13 = pneg %p2084_p10  ;;  %p2091_p3 = por %p2090_p7, %p2089_p11 }
  0x6f   : > { %p2092_p5 = pnand %p2091_p3, %p2085_p13 }
  0x71   : > { %2095 = shalt.err (!%p2092_p5)
}
  0x72   : > { %1922 = dma.hbm_to_vmem [thread:$0]  (!%p2334_p0), %s2431_s9, 512, %s2434_s23, %s2348_s24, %s2952_s22, %s2951_s29, %s2950_s19  }
  0x73   : > { %p2953_p2 = scmp.ne.s32.totalorder %s2947_s13, 0 }
  0x74   : > { %s2464_s26 = sand.u32 (!%p2953_p2), 1, %s2199_s16   ;;  %p2954_p1 = scmp.ne.s32.totalorder (!%p2953_p2), %s2940_s27, 0 }
  0x75   : > { %265 = sbr.rel (%p2953_p2) target bundleno = 1447 (0x5a7), region = 32  ;;  %s2467_s10 = sshll.u32 (!%p2953_p2), %s2464_s26, 5 }
  0x76   : > { %s268_s8 = scalar_lea.sflag (!%p2953_p2), [#allocation4], %s2464_s26  ;;  %s2471_s12 = scalar_lea.vmem (!%p2953_p2), [#allocation3], %s2467_s10 }
  0x7c   : > { %2178 = dma.done.wait (%p2954_p1), %s268_s8, 512  }
  0x7d   : > { %2180 = vsyncadd (%p2954_p1), %s268_s8, 4294966784  ;;  %s276_s24 = sand.u32 1, %s2287_s21   ;;  %s2479_s19 = scalar_lea.vmem [#allocation6], %s2467_s10 }
  0x7e   : > { %s277_s13 = scalar_lea.sflag [#allocation7], %s276_s24 }
  0x7f   : > { %2182 = dma.done.wait (%p2954_p1), %s277_s13, 1024  }
  0x80   : > { %2184 = vsyncadd (%p2954_p1), %s277_s13, 4294966272  ;;  %v2223_v0 = vmov 0.0   ;;  %vm404_vm0 = vcmask 64512   ;;  %vm2224_vm1 = vmmov 0   ;;  %vm362_vm2 = vcmask 1041409   ;;  %s2534_s21 = scalar_lea.vmem [#allocation8], %s2467_s10 }
  0x81   : > { %1862 = vmatprep.subr.mxu0 %v2223_v0  ;;  %1867 = vmatprep.subr.mxu1 %v2223_v0  ;;  %1605 = vst.msk [vmem:[#allocation2] sm:$0xff] %vm404_vm0, %v2223_v0  ;;  %vm365_vm3 = vcmask 1042434   ;;  %vm368_vm4 = vcmask 1043459   ;;  %vm371_vm5 = vcmask 1044484   ;;  %v337_v1 = vld [vmem:[%s2479_s19] sm:$0x1] }
  0x82   : > { %1864 = vmatprep.mubr.msk.f32.mxu0 %vm2224_vm1, %v2223_v0  ;;  %1869 = vmatprep.mubr.msk.f32.mxu1 %vm2224_vm1, %v2223_v0  ;;  %v338_v2 = vld [vmem:[%s2479_s19 + $0x4] sm:$0x1]  ;;  %v339_v3 = vld [vmem:[%s2479_s19 + $0x8] sm:$0x1]  ;;  %v340_v4 = vld [vmem:[%s2479_s19 + $0xc] sm:$0x1] }
  0x83   : > { %v341_v5 = vld [vmem:[%s2479_s19 + $0x10] sm:$0x1]  ;;  %v342_v6 = vld [vmem:[%s2479_s19 + $0x14] sm:$0x1]  ;;  %v343_v7 = vld [vmem:[%s2479_s19 + $0x18] sm:$0x1] }
  0x84   : > { %vm374_vm6 = vcmask 1045509   ;;  %vm377_vm7 = vcmask 1046534   ;;  %v390_v8 = vrot.slane %v338_v2, 7  ;;  %v392_v9 = vrot.slane %v339_v3, 6  ;;  %v344_v10 = vld [vmem:[%s2479_s19 + $0x1c] sm:$0x1] }
  0x85   : > { %v394_v11 = vrot.slane %v340_v4, 5  ;;  %v396_v12 = vrot.slane %v341_v5, 4  ;;  %v398_v13 = vrot.slane %v342_v6, 3  ;;  %v400_v14 = vrot.slane %v343_v7, 2  ;;  %v329_v16 = vld [vmem:[%s2471_s12] sm:$0x1] }
  0x86   : > { %v391_v15 = vsel %vm362_vm2, %v390_v8, %v337_v1  ;;  %v330_v17 = vld [vmem:[%s2471_s12 + $0x4] sm:$0x1]  ;;  %v331_v18 = vld [vmem:[%s2471_s12 + $0x8] sm:$0x1]  ;;  %v332_v20 = vld [vmem:[%s2471_s12 + $0xc] sm:$0x1] }
  0x87   : > { %v393_v19 = vsel %vm365_vm3, %v392_v9, %v391_v15  ;;  %v333_v21 = vld [vmem:[%s2471_s12 + $0x10] sm:$0x1]  ;;  %v334_v22 = vld [vmem:[%s2471_s12 + $0x14] sm:$0x1]  ;;  %v402_v24 = vrot.slane %v344_v10, 1  ;;  %v361_v26 = vrot.slane %v330_v17, 7 }
  0x88   : > { %v395_v23 = vsel %vm368_vm4, %v394_v11, %v393_v19  ;;  %v335_v25 = vld [vmem:[%s2471_s12 + $0x18] sm:$0x1]  ;;  %v364_v27 = vrot.slane %v331_v18, 6  ;;  %vm380_vm8 = vcmask 1047559   ;;  %v336_v29 = vld [vmem:[%s2471_s12 + $0x1c] sm:$0x1] }
  0x89   : > { %v397_v28 = vsel %vm371_vm5, %v396_v12, %v395_v23  ;;  %v367_v30 = vrot.slane %v332_v20, 5  ;;  %v370_v31 = vrot.slane %v333_v21, 4  ;;  %v363_v33 = vsel %vm362_vm2, %v361_v26, %v329_v16  ;;  %v346_v53 = vld [vmem:[%s2534_s21 + $0x4] sm:$0x1]  ;;  %v347_v54 = vld [vmem:[%s2534_s21 + $0x8] sm:$0x1] }
  0x8a   : > { %v399_v32 = vsel %vm374_vm6, %v398_v13, %v397_v28  ;;  %v373_v34 = vrot.slane %v334_v22, 3  ;;  %v366_v36 = vsel %vm365_vm3, %v364_v27, %v363_v33  ;;  %v376_v37 = vrot.slane %v335_v25, 2  ;;  %v345_v56 = vld [vmem:[%s2534_s21] sm:$0x1]  ;;  %v348_v57 = vld [vmem:[%s2534_s21 + $0xc] sm:$0x1] }
  0x8b   : > { %v401_v35 = vsel %vm377_vm7, %v400_v14, %v399_v32  ;;  %v369_v39 = vsel %vm368_vm4, %v367_v30, %v366_v36  ;;  %v379_v40 = vrot.slane %v336_v29, 1  ;;  %v498_v55 = vrot.slane %v346_v53, 7  ;;  %v349_v59 = vld [vmem:[%s2534_s21 + $0x10] sm:$0x1]  ;;  %v350_v60 = vld [vmem:[%s2534_s21 + $0x14] sm:$0x1] }
  0x8c   : > { %v403_v38 = vsel %vm380_vm8, %v402_v24, %v401_v35  ;;  %v372_v41 = vsel %vm371_vm5, %v370_v31, %v369_v39  ;;  %v500_v58 = vrot.slane %v347_v54, 6  ;;  %v351_v61 = vld [vmem:[%s2534_s21 + $0x18] sm:$0x1]  ;;  %v352_v63 = vld [vmem:[%s2534_s21 + $0x1c] sm:$0x1]  ;;  %v502_v2 = vrot.slane %v348_v57, 5 }
  0x8d   : > { %1863 = vmatpush3.xpose.msk.msra.mxu0 %vm404_vm0, %v403_v38  ;;  %v375_v42 = vsel %vm374_vm6, %v373_v34, %v372_v41  ;;  %v499_v62 = vsel %vm362_vm2, %v498_v55, %v345_v56  ;;  %v504_v3 = vrot.slane %v349_v59, 4  ;;  %v506_v4 = vrot.slane %v350_v60, 3  ;;  %v662_v12 = vld [vmem:[%s2479_s19 + $0x5] sm:$0x1]  ;;  %v663_v13 = vld [vmem:[%s2479_s19 + $0x9] sm:$0x1] }
  0x8e   : > { %1877 = vmatprep.subr.mxu0 %v2223_v0  ;;  %v378_v43 = vsel %vm377_vm7, %v376_v37, %v375_v42  ;;  %v501_v1 = vsel %vm365_vm3, %v500_v58, %v499_v62  ;;  %v508_v5 = vrot.slane %v351_v61, 2  ;;  %v510_v7 = vrot.slane %v352_v63, 1  ;;  %v661_v15 = vld [vmem:[%s2479_s19 + $0x1] sm:$0x1]  ;;  %v664_v16 = vld [vmem:[%s2479_s19 + $0xd] sm:$0x1] }
  0x8f   : > { %v381_v44 = vsel %vm380_vm8, %v379_v40, %v378_v43  ;;  %v503_v6 = vsel %vm368_vm4, %v502_v2, %v501_v1  ;;  %v707_v14 = vrot.slane %v662_v12, 7  ;;  %v709_v17 = vrot.slane %v663_v13, 6  ;;  %v654_v19 = vld [vmem:[%s2471_s12 + $0x5] sm:$0x1]  ;;  %v978_v20 = vld [vmem:[%s2479_s19 + $0x6] sm:$0x1] }
  0x90   : > { %1865 = vmatmul.mubr.msk.f32.vlgmr.msra.gmra.mrb[0].mxu0 %vm404_vm0, %v381_v44  ;;  %v505_v8 = vsel %vm371_vm5, %v504_v3, %v503_v6  ;;  %v665_v21 = vld [vmem:[%s2479_s19 + $0x11] sm:$0x1]  ;;  %v711_v22 = vrot.slane %v664_v16, 5  ;;  %v655_v24 = vld [vmem:[%s2471_s12 + $0x9] sm:$0x1]  ;;  %v685_v25 = vrot.slane %v654_v19, 7 }
  0x91   : > { %1879 = vmatprep.mubr.msk.f32.mxu0 %vm2224_vm1, %v2223_v0  ;;  %v507_v9 = vsel %vm374_vm6, %v506_v4, %v505_v8  ;;  %v708_v18 = vsel %vm362_vm2, %v707_v14, %v661_v15  ;;  %v979_v26 = vld [vmem:[%s2479_s19 + $0xa] sm:$0x1]  ;;  %v1023_v27 = vrot.slane %v978_v20, 7  ;;  %v653_v28 = vld [vmem:[%s2471_s12 + $0x1] sm:$0x1]  ;;  %v713_v32 = vrot.slane %v665_v21, 4 }
  0x92   : > { %v509_v10 = vsel %vm377_vm7, %v508_v5, %v507_v9  ;;  %v710_v23 = vsel %vm365_vm3, %v709_v17, %v708_v18  ;;  %v977_v29 = vld [vmem:[%s2479_s19 + $0x2] sm:$0x1]  ;;  %v970_v30 = vld [vmem:[%s2471_s12 + $0x6] sm:$0x1]  ;;  %v666_v31 = vld [vmem:[%s2479_s19 + $0x15] sm:$0x1]  ;;  %v686_v40 = vsel %vm362_vm2, %v685_v25, %v653_v28 }
  0x93   : > { %v511_v11 = vsel %vm380_vm8, %v510_v7, %v509_v10  ;;  %v1294_v33 = vld [vmem:[%s2479_s19 + $0x7] sm:$0x1]  ;;  %v712_v34 = vsel %vm368_vm4, %v711_v22, %v710_v23  ;;  %v656_v35 = vld [vmem:[%s2471_s12 + $0xd] sm:$0x1]  ;;  %v687_v36 = vrot.slane %v655_v24, 6  ;;  %v1025_v38 = vrot.slane %v979_v26, 6 }
  0x94   : > { %1868 = vmatpush3.msra.mxu1 %v511_v11  ;;  %v980_v37 = vld [vmem:[%s2479_s19 + $0xe] sm:$0x1]  ;;  %v2572_v39 = vld [vmem:[%s2479_s19 + $0x19] sm:$0x1]  ;;  %v1024_v41 = vsel %vm362_vm2, %v1023_v27, %v977_v29  ;;  %v969_v42 = vld [vmem:[%s2471_s12 + $0x2] sm:$0x1] }
  0x95   : > { %1872 = vmatprep.subr.mxu1 %v2223_v0  ;;  %v971_v43 = vld [vmem:[%s2471_s12 + $0xa] sm:$0x1]  ;;  %v1001_v44 = vrot.slane %v970_v30, 7  ;;  %v1293_v53 = vld [vmem:[%s2479_s19 + $0x3] sm:$0x1]  ;;  %v688_v56 = vsel %vm365_vm3, %v687_v36, %v686_v40  ;;  %v1026_v58 = vsel %vm365_vm3, %v1025_v38, %v1024_v41  ;;  %v1027_v59 = vrot.slane %v980_v37, 5 }
  0x96   : > { %v2584_v55 = vld [vmem:[%s2479_s19 + $0x1d] sm:$0x1]  ;;  %v981_v57 = vld [vmem:[%s2479_s19 + $0x12] sm:$0x1]  ;;  %v972_v60 = vld [vmem:[%s2471_s12 + $0xe] sm:$0x1] }
  0x97   : > { %v1003_v61 = vrot.slane %v971_v43, 6  ;;  %v1002_v62 = vsel %vm362_vm2, %v1001_v44, %v969_v42  ;;  %v1296_v63 = vld [vmem:[%s2479_s19 + $0xf] sm:$0x1]  ;;  %v1287_v2 = vld [vmem:[%s2471_s12 + $0xb] sm:$0x1]  ;;  %v717_v4 = vrot.slane %v2572_v39, 2  ;;  %v1028_v15 = vsel %vm368_vm4, %v1027_v59, %v1026_v58 }
  0x98   : > { %v658_v5 = vld [vmem:[%s2471_s12 + $0x15] sm:$0x1]  ;;  %v1285_v8 = vld [vmem:[%s2471_s12 + $0x3] sm:$0x1]  ;;  %v982_v11 = vld [vmem:[%s2479_s19 + $0x16] sm:$0x1] }
  0x99   : > { %v1029_v12 = vrot.slane %v981_v57, 4  ;;  %v973_v13 = vld [vmem:[%s2471_s12 + $0x12] sm:$0x1]  ;;  %v1005_v14 = vrot.slane %v972_v60, 5  ;;  %v1004_v16 = vsel %vm365_vm3, %v1003_v61, %v1002_v62  ;;  %v1297_v17 = vld [vmem:[%s2479_s19 + $0x13] sm:$0x1] }
  0x9a   : > { %v1343_v18 = vrot.slane %v1296_v63, 5  ;;  %v1288_v19 = vld [vmem:[%s2471_s12 + $0xf] sm:$0x1]  ;;  %v1319_v20 = vrot.slane %v1287_v2, 6  ;;  %v719_v21 = vrot.slane %v2584_v55, 1  ;;  %v693_v23 = vrot.slane %v658_v5, 3 }
  0x9b   : > { %v659_v22 = vld [vmem:[%s2471_s12 + $0x19] sm:$0x1]  ;;  %v983_v27 = vld [vmem:[%s2479_s19 + $0x1a] sm:$0x1]  ;;  %v1031_v28 = vrot.slane %v982_v11, 3  ;;  %v1007_v30 = vrot.slane %v973_v13, 4 }
  0x9c   : > { %v974_v29 = vld [vmem:[%s2471_s12 + $0x16] sm:$0x1]  ;;  %v1321_v36 = vrot.slane %v1288_v19, 5  ;;  %v660_v38 = vld [vmem:[%s2471_s12 + $0x1d] sm:$0x1]  ;;  %v695_v39 = vrot.slane %v659_v22, 2 }
  0x9d   : > { %v984_v43 = vld [vmem:[%s2479_s19 + $0x1e] sm:$0x1]  ;;  %v1033_v44 = vrot.slane %v983_v27, 2  ;;  %v1291_v5 = vld [vmem:[%s2471_s12 + $0x1b] sm:$0x1]  ;;  %vm644_vm9 = vcmask 57344  }
  0x9e   : > { %v1035_v61 = vrot.slane %v984_v43, 1  ;;  %v976_v62 = vld [vmem:[%s2471_s12 + $0x1e] sm:$0x1]  ;;  %v1292_v13 = vld [vmem:[%s2471_s12 + $0x1f] sm:$0x1]  ;;  %s2675_s27 = scalar_lea.vmem [#allocation9], %s2467_s10 }
  0x9f   : > { %v2225_v22 = vmov 1966171168   ;;  %s1827_s29 = sshll.u32 %s2464_s26, 3  ;;  %s1843_s9 = sshll.u32 %s2207_s18, 7 }
  0xa0   : > { %s328_s22 = scalar_lea.vmem [#allocation10], %s1827_s29  ;;  %s2774_s25 = scalar_lea.hbm %s2920_s4, %s1843_s9 }
  0xa1   : > { %s1650_s14 = sshll.u32 %s328_s22, 4  ;;  %s1621_s20 = scalar_lea.sflag [#allocation11], %s2464_s26  ;;  %s1651_s14 = int_to_ptr.vmem [resolvable:$true] %s1650_s14 }
  0xa2   : > { %s2097_s1 = scalar_lea.vmem %s1651_s14, 128  ;;  %p2955_p6 = scmp.ne.s32.totalorder %s2941_s28, 0 }
  0xa3   : > { %p2098_p0 = scmp.ne.s32.totalorder %s1651_s14, %s2097_s1  ;;  %s2226_s6 = smov [#allocation10]  }
  0xa4   : > { %s2101_s5 = sshll.u32 %s2226_s6, 4  ;;  %s2102_s5 = int_to_ptr.vmem [resolvable:$false] %s2101_s5 }
  0xa5   : > { %p2099_p8 = pnand %p2098_p0, %p2955_p6  ;;  %s2103_s11 = scalar_lea.vmem %s2102_s5, 256 }
  0xa6   : > { %p2104_p12 = scmp.lt.s32.totalorder %s1651_s14, %s2102_s5  ;;  %p2105_p4 = scmp.lt.s32.totalorder %s2103_s11, %s2097_s1 }
  0xa7   : > { %p2100_p9 = pneg %p2099_p8 }
  0xa8   : > { %p2106_p10 = por %p2105_p4, %p2104_p12 }
  0xaa   : > { %p2107_p13 = pnand %p2106_p10, %p2100_p9 }
 0x163   : > { %v475_v45 = vpop.f32.mrb[0].mxu0 }
 0x164   : > { %v1866_v46 = vpop.f32.mrb[1].mxu0  ;;  %v479_v47 = vsel %vm404_vm0, %v475_v45, -inf }
 0x165   : > { %480 = vmax.xlane.f32.xlu0 %v479_v47  ;;  %v1339_v46 = vrot.slane %v1294_v33, 7  ;;  %v1286_v47 = vld [vmem:[%s2471_s12 + $0x7] sm:$0x1]  ;;  %v1298_v33 = vld [vmem:[%s2479_s19 + $0x17] sm:$0x1] }
 0x166   : > { %v1317_v3 = vrot.slane %v1286_v47, 7 }
 0x167   : > { %v1340_v7 = vsel %vm362_vm2, %v1339_v46, %v1293_v53  ;;  %v1009_v46 = vrot.slane %v974_v29, 3 }
 0x168   : > { %v1318_v25 = vsel %vm362_vm2, %v1317_v3, %v1285_v8  ;;  %v1300_v3 = vld [vmem:[%s2479_s19 + $0x1f] sm:$0x1] }
 0x169   : > { %v1320_v41 = vsel %vm365_vm3, %v1319_v20, %v1318_v25 }
 0x16a   : > { %v1322_v58 = vsel %vm368_vm4, %v1321_v36, %v1320_v41 }
 0x1f2   : > { %v481_v48 = vpop.xlane.xlu0 %480 }
 0x1f3   : > { %v482_v49 = vsub.f32 %v475_v45, %v481_v48  ;;  %v1295_v45 = vld [vmem:[%s2479_s19 + $0xb] sm:$0x1]  ;;  %v714_v48 = vsel %vm371_vm5, %v713_v32, %v712_v34  ;;  %v1006_v32 = vsel %vm368_vm4, %v1005_v14, %v1004_v16  ;;  %v1345_v34 = vrot.slane %v1297_v17, 4 }
 0x1f4   : > { %v1341_v1 = vrot.slane %v1295_v45, 6  ;;  %v975_v45 = vld [vmem:[%s2471_s12 + $0x1a] sm:$0x1]  ;;  %v1327_v14 = vrot.slane %v1291_v5, 2 }
 0x1f5   : > { %v483_v50 = vmul.f32 1.442695, %v482_v49  ;;  %v715_v49 = vrot.slane %v666_v31, 3  ;;  %v1030_v31 = vsel %vm371_vm5, %v1029_v12, %v1028_v15  ;;  %v1011_v63 = vrot.slane %v975_v45, 2 }
 0x1f6   : > { %v1342_v24 = vsel %vm365_vm3, %v1341_v1, %v1340_v7  ;;  %v1032_v47 = vsel %vm374_vm6, %v1031_v28, %v1030_v31  ;;  %v1351_v12 = vrot.slane %v1300_v3, 1 }
 0x1f7   : > { %1989 = vpow2.f32 %v483_v50  ;;  %v657_v50 = vld [vmem:[%s2471_s12 + $0x11] sm:$0x1]  ;;  %v716_v9 = vsel %vm374_vm6, %v715_v49, %v714_v48  ;;  %v1344_v40 = vsel %vm368_vm4, %v1343_v18, %v1342_v24  ;;  %v1008_v48 = vsel %vm371_vm5, %v1007_v30, %v1006_v32  ;;  %v1299_v49 = vld [vmem:[%s2479_s19 + $0x1b] sm:$0x1] }
 0x1f8   : > { %v691_v6 = vrot.slane %v657_v50, 4  ;;  %v718_v37 = vsel %vm377_vm7, %v717_v4, %v716_v9  ;;  %v1347_v50 = vrot.slane %v1298_v33, 3  ;;  %v1346_v57 = vsel %vm371_vm5, %v1345_v34, %v1344_v40 }
 0x1f9   : > { %v720_v55 = vsel %vm380_vm8, %v719_v21, %v718_v37  ;;  %v1034_v1 = vsel %vm377_vm7, %v1033_v44, %v1032_v47  ;;  %v1010_v2 = vsel %vm374_vm6, %v1009_v46, %v1008_v48  ;;  %v1349_v4 = vrot.slane %v1299_v49, 2 }
 0x1fa   : > { %v1013_v9 = vrot.slane %v976_v62, 1  ;;  %v1012_v11 = vsel %vm377_vm7, %v1011_v63, %v1010_v2  ;;  %v1329_v18 = vrot.slane %v1292_v13, 1  ;;  %v591_v24 = vlaneseq }
 0x1fc   : > { %v1014_v17 = vsel %vm380_vm8, %v1013_v9, %v1012_v11  ;;  %v672_v9 = vld [vmem:[%s2534_s21 + $0xd] sm:$0x1]  ;;  %v673_v11 = vld [vmem:[%s2534_s21 + $0x11] sm:$0x1] }
 0x1fd   : > { %v818_v13 = vrot.slane %v672_v9, 5  ;;  %v1308_v9 = vld [vmem:[%s2534_s21 + $0x1f] sm:$0x1] }
 0x201   : > { %v2529_v51 = vpop.eup %1989 }
 0x202   : > { %v485_v52 = vsel %vm404_vm0, %v2529_v51, 0.0 }
 0x203   : > { %486 = vadd.xlane.f32.xlu0 %v485_v52  ;;  %v689_v52 = vrot.slane %v656_v35, 5  ;;  %v1289_v35 = vld [vmem:[%s2471_s12 + $0x13] sm:$0x1] }
 0x204   : > { %v1323_v53 = vrot.slane %v1289_v35, 4 }
 0x205   : > { %v690_v10 = vsel %vm368_vm4, %v689_v52, %v688_v56  ;;  %v1290_v52 = vld [vmem:[%s2471_s12 + $0x17] sm:$0x1]  ;;  %v697_v56 = vrot.slane %v660_v38, 1 }
 0x206   : > { %v692_v26 = vsel %vm371_vm5, %v691_v6, %v690_v10  ;;  %v1325_v6 = vrot.slane %v1290_v52, 3  ;;  %v1324_v7 = vsel %vm371_vm5, %v1323_v53, %v1322_v58  ;;  %v1036_v10 = vsel %vm380_vm8, %v1035_v61, %v1034_v1 }
 0x207   : > { %v694_v42 = vsel %vm374_vm6, %v693_v23, %v692_v26  ;;  %v589_v23 = vunpack.c.l.s4 %v2225_v22  ;;  %v592_v26 = vshrl.u32 %v591_v24, 7 }
 0x208   : > { %v696_v60 = vsel %vm377_vm7, %v695_v39, %v694_v42  ;;  %v1326_v16 = vsel %vm374_vm6, %v1325_v6, %v1324_v7  ;;  %v670_v6 = vld [vmem:[%s2534_s21 + $0x5] sm:$0x1] }
 0x209   : > { %v698_v8 = vsel %vm380_vm8, %v697_v56, %v696_v60  ;;  %v1328_v20 = vsel %vm377_vm7, %v1327_v14, %v1326_v16  ;;  %v590_v25 = vunpack.c.0.s8 %v589_v23  ;;  %v814_v7 = vrot.slane %v670_v6, 7  ;;  %v674_v14 = vld [vmem:[%s2534_s21 + $0x15] sm:$0x1] }
 0x20a   : > { %v1330_v21 = vsel %vm380_vm8, %v1329_v18, %v1328_v20  ;;  %v820_v16 = vrot.slane %v673_v11, 4  ;;  %v676_v20 = vld [vmem:[%s2534_s21 + $0x1d] sm:$0x1] }
 0x20b   : > { %v2667_v27 = vsub.s32 %v590_v25, %v592_v26  ;;  %v826_v24 = vrot.slane %v676_v20, 1 }
 0x290   : > { %v487_v54 = vpop.xlane.xlu0 %486 }
 0x291   : > { %1991 = vrcp.f32 %v487_v54 }
 0x29b   : > { %v1992_v54 = vpop.eup %1991 }
 0x29c   : > { %v2631_v59 = vmul.f32 %v1992_v54, %v2529_v51  ;;  %v1348_v51 = vsel %vm374_vm6, %v1347_v50, %v1346_v57 }
 0x29d   : > { %v1350_v15 = vsel %vm377_vm7, %v1349_v4, %v1348_v51  ;;  %v671_v51 = vld [vmem:[%s2534_s21 + $0x9] sm:$0x1] }
 0x29e   : > { %1870 = vmatmul.mubr.msk.f32.vlgmr.msra.gmra.mrb[0].mxu1 %vm404_vm0, %v2631_v59  ;;  %v1352_v19 = vsel %vm380_vm8, %v1351_v12, %v1350_v15 }
 0x29f   : > { %1873 = vmatpush3.xpose.msk.msra.mxu1 %vm404_vm0, %v720_v55  ;;  %1874 = vmatprep.mubr.msk.f32.mxu1 %vm2224_vm1, %v2223_v0 }
 0x2a0   : > { %1882 = vmatprep.subr.mxu1 %v2223_v0 }
 0x2a2   : > { %1875 = vmatmul.mubr.msk.f32.vlgmr.msra.gmra.mrb[2].mxu1 %vm404_vm0, %v698_v8  ;;  %v669_v8 = vld [vmem:[%s2534_s21 + $0x1] sm:$0x1] }
 0x2a3   : > { %1883 = vmatpush3.xpose.msk.msra.mxu1 %vm404_vm0, %v1036_v10  ;;  %1884 = vmatprep.mubr.msk.f32.mxu1 %vm2224_vm1, %v2223_v0  ;;  %v816_v10 = vrot.slane %v671_v51, 6  ;;  %v815_v12 = vsel %vm362_vm2, %v814_v7, %v669_v8 }
 0x2a4   : > { %1892 = vmatprep.subr.mxu1 %v2223_v0 }
 0x2a5   : > { %v817_v15 = vsel %vm365_vm3, %v816_v10, %v815_v12 }
 0x2a6   : > { %1885 = vmatmul.mubr.msk.f32.vlgmr.msra.gmra.mrb[4].mxu1 %vm404_vm0, %v1014_v17  ;;  %v675_v17 = vld [vmem:[%s2534_s21 + $0x19] sm:$0x1]  ;;  %v819_v18 = vsel %vm368_vm4, %v818_v13, %v817_v15  ;;  %v1458_v15 = vrot.slane %v1308_v9, 1 }
 0x2a7   : > { %1893 = vmatpush3.xpose.msk.msra.mxu1 %vm404_vm0, %v1352_v19  ;;  %1894 = vmatprep.mubr.msk.f32.mxu1 %vm2224_vm1, %v2223_v0  ;;  %v822_v19 = vrot.slane %v674_v14, 3  ;;  %v824_v22 = vrot.slane %v675_v17, 2 }
 0x2aa   : > { %1895 = vmatmul.mubr.msk.f32.vlgmr.msra.gmra.mrb[6].mxu1 %vm404_vm0, %v1330_v21  ;;  %v821_v21 = vsel %vm371_vm5, %v820_v16, %v819_v18 }
 0x2ab   : > { %v823_v23 = vsel %vm374_vm6, %v822_v19, %v821_v21 }
 0x2ac   : > { %v825_v25 = vsel %vm377_vm7, %v824_v22, %v823_v23  ;;  %v1606_v23 = vld [vmem:[#allocation2] sm:$0xff] }
 0x2ad   : > { %v827_v26 = vsel %vm380_vm8, %v826_v24, %v825_v25 }
 0x2ae   : > { %1878 = vmatpush3.msra.mxu0 %v827_v26 }
 0x2af   : > { %1887 = vmatprep.subr.mxu0 %v2223_v0 }
 0x371   : > { %v582_v28 = vpop.f32.mrb[0].mxu1 }
 0x372   : > { %v587_v29 = vcombine.high %v582_v28, %v582_v28  ;;  %v594_v30 = vrot.slane %v582_v28, %v2667_v27  ;;  %v1871_v31 = vpop.f32.mrb[1].mxu1  ;;  %v986_v28 = vld [vmem:[%s2534_s21 + $0x6] sm:$0x1] }
 0x373   : > { %v985_v31 = vld [vmem:[%s2534_s21 + $0x2] sm:$0x1] }
 0x374   : > { %v601_v32 = vrot.slane %v587_v29, %v2667_v27  ;;  %v602_v33 = vcombine.high %v594_v30, %v594_v30  ;;  %v610_v34 = vrot.slane %v594_v30, %v2667_v27  ;;  %v987_v29 = vld [vmem:[%s2534_s21 + $0xa] sm:$0x1]  ;;  %v1130_v30 = vrot.slane %v986_v28, 7 }
 0x375   : > { %v791_v35 = vpop.f32.mrb[2].mxu1 }
 0x376   : > { %v603_v36 = vcombine.high %v601_v32, %v601_v32  ;;  %v617_v37 = vrot.slane %v601_v32, %v2667_v27  ;;  %v624_v38 = vrot.slane %v602_v33, %v2667_v27  ;;  %v632_v39 = vcombine.high %v610_v34, %v610_v34  ;;  %645 = vst.msk [vmem:[%s2675_s27] sm:$0x1] %vm644_vm9, %v610_v34  ;;  %v1876_v40 = vpop.f32.mrb[3].mxu1  ;;  %v1302_v32 = vld [vmem:[%s2534_s21 + $0x7] sm:$0x1] }
 0x377   : > { %v795_v41 = vsel %vm404_vm0, %v791_v35, -inf  ;;  %v988_v33 = vld [vmem:[%s2534_s21 + $0xe] sm:$0x1]  ;;  %v1132_v34 = vrot.slane %v987_v29, 6 }
 0x378   : > { %v631_v42 = vrot.slane %v603_v36, %v2667_v27  ;;  %v633_v43 = vcombine.high %v617_v37, %v617_v37  ;;  %v634_v44 = vcombine.high %v624_v38, %v624_v38  ;;  %646 = vst.msk [vmem:[%s2675_s27 + $0x4] sm:$0x1] %vm644_vm9, %v624_v38  ;;  %647 = vst.msk [vmem:[%s2675_s27 + $0x8] sm:$0x1] %vm644_vm9, %v632_v39  ;;  %796 = vmax.xlane.f32.xlu1 %v795_v41  ;;  %v1303_v36 = vld [vmem:[%s2534_s21 + $0xb] sm:$0x1] }
 0x379   : > { %649 = vst.msk [vmem:[%s2675_s27 + $0x10] sm:$0x1] %vm644_vm9, %v617_v37  ;;  %v1107_v45 = vpop.f32.mrb[4].mxu1  ;;  %v1446_v37 = vrot.slane %v1302_v32, 7  ;;  %v1301_v38 = vld [vmem:[%s2534_s21 + $0x3] sm:$0x1] }
 0x37a   : > { %v635_v46 = vcombine.high %v631_v42, %v631_v42  ;;  %648 = vst.msk [vmem:[%s2675_s27 + $0xc] sm:$0x1] %vm644_vm9, %v634_v44  ;;  %650 = vst.msk [vmem:[%s2675_s27 + $0x14] sm:$0x1] %vm644_vm9, %v631_v42  ;;  %v1886_v47 = vpop.f32.mrb[5].mxu1  ;;  %v1111_v48 = vsel %vm404_vm0, %v1107_v45, -inf }
 0x37b   : > { %651 = vst.msk [vmem:[%s2675_s27 + $0x18] sm:$0x1] %vm644_vm9, %v633_v43  ;;  %v989_v39 = vld [vmem:[%s2534_s21 + $0x12] sm:$0x1]  ;;  %v1134_v40 = vrot.slane %v988_v33, 5  ;;  %v1448_v43 = vrot.slane %v1303_v36, 6  ;;  %v1447_v44 = vsel %vm362_vm2, %v1446_v37, %v1301_v38 }
 0x37c   : > { %652 = vst.msk [vmem:[%s2675_s27 + $0x1c] sm:$0x1] %vm644_vm9, %v635_v46  ;;  %1112 = vmax.xlane.f32.xlu1 %v1111_v48  ;;  %v1304_v42 = vld [vmem:[%s2534_s21 + $0xf] sm:$0x1]  ;;  %v1136_v46 = vrot.slane %v989_v39, 4 }
 0x37d   : > { %v1423_v49 = vpop.f32.mrb[6].mxu1 }
 0x37e   : > { %v1896_v50 = vpop.f32.mrb[7].mxu1  ;;  %v1427_v52 = vsel %vm404_vm0, %v1423_v49, -inf }
 0x37f   : > { %1428 = vmax.xlane.f32.xlu0 %v1427_v52  ;;  %v1450_v50 = vrot.slane %v1304_v42, 5  ;;  %v1449_v52 = vsel %vm365_vm3, %v1448_v43, %v1447_v44 }
 0x405   : > { %v797_v53 = vpop.xlane.xlu1 %796 }
 0x406   : > { %v798_v54 = vsub.f32 %v791_v35, %v797_v53  ;;  %v1131_v35 = vsel %vm362_vm2, %v1130_v30, %v985_v31  ;;  %v991_v53 = vld [vmem:[%s2534_s21 + $0x1a] sm:$0x1] }
 0x407   : > { %v1133_v41 = vsel %vm365_vm3, %v1132_v34, %v1131_v35 }
 0x408   : > { %v799_v55 = vmul.f32 1.442695, %v798_v54  ;;  %v1135_v48 = vsel %vm368_vm4, %v1134_v40, %v1133_v41 }
 0x409   : > { %v1113_v56 = vpop.xlane.xlu1 %1112 }
 0x40a   : > { %1993 = vpow2.f32 %v799_v55  ;;  %v1114_v57 = vsub.f32 %v1107_v45, %v1113_v56  ;;  %v990_v45 = vld [vmem:[%s2534_s21 + $0x16] sm:$0x1]  ;;  %v1137_v55 = vsel %vm371_vm5, %v1136_v46, %v1135_v48  ;;  %v1306_v56 = vld [vmem:[%s2534_s21 + $0x17] sm:$0x1] }
 0x40b   : > { %v1138_v54 = vrot.slane %v990_v45, 3 }
 0x40c   : > { %v1115_v58 = vmul.f32 1.442695, %v1114_v57  ;;  %v1429_v60 = vpop.xlane.xlu0 %1428 }
 0x40d   : > { %v1430_v61 = vsub.f32 %v1423_v49, %v1429_v60  ;;  %v1305_v49 = vld [vmem:[%s2534_s21 + $0x13] sm:$0x1]  ;;  %v1451_v60 = vsel %vm368_vm4, %v1450_v50, %v1449_v52 }
 0x40e   : > { %1995 = vpow2.f32 %v1115_v58  ;;  %v1452_v57 = vrot.slane %v1305_v49, 4 }
 0x40f   : > { %v1431_v62 = vmul.f32 1.442695, %v1430_v61  ;;  %v992_v61 = vld [vmem:[%s2534_s21 + $0x1e] sm:$0x1] }
 0x410   : > { %v1453_v51 = vsel %vm371_vm5, %v1452_v57, %v1451_v60  ;;  %v1142_v7 = vrot.slane %v992_v61, 1 }
 0x411   : > { %1997 = vpow2.f32 %v1431_v62  ;;  %v1140_v62 = vrot.slane %v991_v53, 2 }
 0x414   : > { %v2697_v63 = vpop.eup %1993 }
 0x415   : > { %v801_v1 = vsel %vm404_vm0, %v2697_v63, 0.0 }
 0x416   : > { %802 = vadd.xlane.f32.xlu1 %v801_v1  ;;  %v1139_v1 = vsel %vm374_vm6, %v1138_v54, %v1137_v55 }
 0x417   : > { %v1141_v8 = vsel %vm377_vm7, %v1140_v62, %v1139_v1 }
 0x418   : > { %v2701_v2 = vpop.eup %1995  ;;  %v1143_v14 = vsel %vm380_vm8, %v1142_v7, %v1141_v8 }
 0x419   : > { %v1117_v3 = vsel %vm404_vm0, %v2701_v2, 0.0 }
 0x41a   : > { %1118 = vadd.xlane.f32.xlu0 %v1117_v3  ;;  %v1307_v3 = vld [vmem:[%s2534_s21 + $0x1b] sm:$0x1] }
 0x41b   : > { %v2705_v4 = vpop.eup %1997  ;;  %v1456_v10 = vrot.slane %v1307_v3, 2 }
 0x41c   : > { %v1433_v5 = vsel %vm404_vm0, %v2705_v4, 0.0 }
 0x41d   : > { %1434 = vadd.xlane.f32.xlu1 %v1433_v5  ;;  %v1454_v5 = vrot.slane %v1306_v56, 3 }
 0x41f   : > { %v1455_v11 = vsel %vm374_vm6, %v1454_v5, %v1453_v51 }
 0x420   : > { %v1457_v16 = vsel %vm377_vm7, %v1456_v10, %v1455_v11 }
 0x421   : > { %v1459_v19 = vsel %vm380_vm8, %v1458_v15, %v1457_v16 }
 0x4a3   : > { %v803_v47 = vpop.xlane.xlu1 %802 }
 0x4a4   : > { %1999 = vrcp.f32 %v803_v47 }
 0x4a7   : > { %v1119_v58 = vpop.xlane.xlu0 %1118 }
 0x4a8   : > { %2001 = vrcp.f32 %v1119_v58 }
 0x4aa   : > { %v1435_v6 = vpop.xlane.xlu1 %1434 }
 0x4ab   : > { %2003 = vrcp.f32 %v1435_v6 }
 0x4ae   : > { %v2000_v12 = vpop.eup %1999 }
 0x4af   : > { %v805_v13 = vmul.f32 %v2000_v12, %v2697_v63 }
 0x4b1   : > { %1880 = vmatmul.mubr.msk.f32.vlgmr.msra.gmra.mrb[2].mxu0 %vm404_vm0, %v805_v13  ;;  %v902_v63 = vadd.f32 %v805_v13, %v2631_v59 }
 0x4b2   : > { %v2002_v17 = vpop.eup %2001  ;;  %1888 = vmatpush3.msra.mxu0 %v1143_v14  ;;  %1889 = vmatprep.mubr.msk.f32.mxu0 %vm2224_vm1, %v2223_v0 }
 0x4b3   : > { %v1121_v18 = vmul.f32 %v2002_v17, %v2701_v2  ;;  %1897 = vmatprep.subr.mxu0 %v2223_v0 }
 0x4b5   : > { %v2004_v20 = vpop.eup %2003  ;;  %1890 = vmatmul.mubr.msk.f32.vlgmr.msra.gmra.mrb[4].mxu0 %vm404_vm0, %v1121_v18  ;;  %v1218_v21 = vadd.f32 %v1121_v18, %v902_v63 }
 0x4b6   : > { %v1437_v22 = vmul.f32 %v2004_v20, %v2705_v4  ;;  %1898 = vmatpush3.msra.mxu0 %v1459_v19  ;;  %1899 = vmatprep.mubr.msk.f32.mxu0 %vm2224_vm1, %v2223_v0 }
 0x4b8   : > { %v1534_v2 = vadd.f32 %v1437_v22, %v1218_v21 }
 0x4b9   : > { %1900 = vmatmul.mubr.msk.f32.vlgmr.msra.gmra.mrb[6].mxu0 %vm404_vm0, %v1437_v22 }
 0x4ba   : > { %v1607_v24 = vadd.f32 %v1606_v23, %v1534_v2 }
 0x4bc   : > { %1608 = vst.msk [vmem:[#allocation2] sm:$0xff] %vm404_vm0, %v1607_v24 }
 0x4c3   : > { %v1612_v59 = vld [vmem:[#allocation2] sm:$0xff] }
 0x4c4   : > { %v1613_v25 = vmul.f32 0.25, %v1612_v59 }
 0x4c6   : > { %1614 = vst.msk [vmem:[%s328_s22] sm:$0xff] %vm404_vm0, %v1613_v25 }
 0x4c7   : > { %2110 = shalt.err (!%p2107_p13)
}
 0x4c8   : > { %s2111_s0 = scalar_lea.hbm %s2774_s25, 128  ;;  %s2115_s12 = scalar_lea.hbm %s2920_s4, 256 }
 0x4c9   : > { %p2112_p11 = scmp.ne.s32.totalorder %s2774_s25, %s2111_s0  ;;  %p2116_p5 = scmp.lt.u32.totalorder %s2774_s25, %s2920_s4 }
 0x4ca   : > { %p2117_p2 = scmp.lt.u32.totalorder %s2115_s12, %s2111_s0  ;;  %p2119_p0 = scmp.lt.u32.totalorder %s2111_s0, %s2774_s25 }
 0x4cb   : > { %p2113_p7 = pnand %p2112_p11, %p2955_p6 }
 0x4cc   : > { %p2118_p1 = por %p2117_p2, %p2116_p5 }
 0x4cd   : > { %p2114_p3 = pneg %p2113_p7 }
 0x4ce   : > { %p2120_p8 = por %p2119_p0, %p2118_p1 }
 0x4d0   : > { %p2121_p9 = pnand %p2120_p8, %p2114_p3 }
 0x4d2   : > { %2124 = shalt.err (!%p2121_p9)
}
 0x4d3   : > { %1910 = dma.vmem_to_hbm [thread:$0]  (%p2955_p6), %s1651_s14, 128, %s2774_s25, %s1621_s20  }
 0x4d4   : > { %s1842_s19 = sshll.u32 %s2207_s18, 6  ;;  %s1634_s21 = sshll.u32 %s2675_s27, 4  ;;  %s2859_s21 = int_to_ptr.vmem [resolvable:$true] %s1634_s21 }
 0x4d5   : > { %s2855_s22 = scalar_lea.hbm %s2919_s3, %s1842_s19  ;;  %s1616_s9 = scalar_lea.sflag [#allocation5], %s2464_s26 }
 0x4d6   : > { %s2125_s23 = scalar_lea.vmem %s2859_s21, 512  ;;  %s2227_s7 = smov [#allocation9]  }
 0x4d7   : > { %p2126_p12 = scmp.ne.s32.totalorder %s2859_s21, %s2125_s23  ;;  %s2129_s25 = sshll.u32 %s2227_s7, 4  ;;  %s2130_s25 = int_to_ptr.vmem [resolvable:$false] %s2129_s25 }
 0x4d8   : > { %s2131_s14 = scalar_lea.vmem %s2130_s25, 1024  ;;  %p2132_p13 = scmp.lt.s32.totalorder %s2859_s21, %s2130_s25 }
 0x4d9   : > { %p2127_p4 = pnand %p2126_p12, %p2955_p6  ;;  %p2133_p11 = scmp.lt.s32.totalorder %s2131_s14, %s2125_s23 }
 0x4db   : > { %p2128_p10 = pneg %p2127_p4  ;;  %p2134_p7 = por %p2133_p11, %p2132_p13 }
 0x4dd   : > { %p2135_p3 = pnand %p2134_p7, %p2128_p10 }
 0x584   : > { %v898_v0 = vpop.f32.mrb[2].mxu0 }
 0x585   : > { %v904_v4 = vcombine.high %v898_v0, %v898_v0  ;;  %v911_v26 = vrot.slane %v898_v0, %v2667_v27  ;;  %v1881_v28 = vpop.f32.mrb[3].mxu0 }
 0x587   : > { %v918_v29 = vrot.slane %v904_v4, %v2667_v27  ;;  %v919_v30 = vcombine.high %v911_v26, %v911_v26  ;;  %v927_v31 = vrot.slane %v911_v26, %v2667_v27 }
 0x588   : > { %v1214_v32 = vpop.f32.mrb[4].mxu0 }
 0x589   : > { %v920_v33 = vcombine.high %v918_v29, %v918_v29  ;;  %v934_v34 = vrot.slane %v918_v29, %v2667_v27  ;;  %v941_v35 = vrot.slane %v919_v30, %v2667_v27  ;;  %v949_v36 = vcombine.high %v927_v31, %v927_v31  ;;  %961 = vst.msk [vmem:[%s2675_s27 + $0x1] sm:$0x1] %vm644_vm9, %v927_v31  ;;  %v1891_v37 = vpop.f32.mrb[5].mxu0 }
 0x58a   : > { %v1220_v38 = vcombine.high %v1214_v32, %v1214_v32  ;;  %v1227_v39 = vrot.slane %v1214_v32, %v2667_v27 }
 0x58b   : > { %v948_v40 = vrot.slane %v920_v33, %v2667_v27  ;;  %v950_v41 = vcombine.high %v934_v34, %v934_v34  ;;  %v951_v42 = vcombine.high %v941_v35, %v941_v35  ;;  %962 = vst.msk [vmem:[%s2675_s27 + $0x5] sm:$0x1] %vm644_vm9, %v941_v35  ;;  %963 = vst.msk [vmem:[%s2675_s27 + $0x9] sm:$0x1] %vm644_vm9, %v949_v36 }
 0x58c   : > { %965 = vst.msk [vmem:[%s2675_s27 + $0x11] sm:$0x1] %vm644_vm9, %v934_v34  ;;  %v1234_v43 = vrot.slane %v1220_v38, %v2667_v27  ;;  %v1235_v44 = vcombine.high %v1227_v39, %v1227_v39  ;;  %v1243_v45 = vrot.slane %v1227_v39, %v2667_v27  ;;  %v1530_v46 = vpop.f32.mrb[6].mxu0 }
 0x58d   : > { %v952_v47 = vcombine.high %v948_v40, %v948_v40  ;;  %964 = vst.msk [vmem:[%s2675_s27 + $0xd] sm:$0x1] %vm644_vm9, %v951_v42  ;;  %966 = vst.msk [vmem:[%s2675_s27 + $0x15] sm:$0x1] %vm644_vm9, %v948_v40  ;;  %v1536_v48 = vcombine.high %v1530_v46, %v1530_v46  ;;  %v1543_v49 = vrot.slane %v1530_v46, %v2667_v27  ;;  %v1901_v50 = vpop.f32.mrb[7].mxu0 }
 0x58e   : > { %967 = vst.msk [vmem:[%s2675_s27 + $0x19] sm:$0x1] %vm644_vm9, %v950_v41  ;;  %v1236_v52 = vcombine.high %v1234_v43, %v1234_v43  ;;  %v1250_v53 = vrot.slane %v1234_v43, %v2667_v27  ;;  %v1257_v54 = vrot.slane %v1235_v44, %v2667_v27  ;;  %v1265_v55 = vcombine.high %v1243_v45, %v1243_v45 }
 0x58f   : > { %1277 = vst.msk [vmem:[%s2675_s27 + $0x2] sm:$0x1] %vm644_vm9, %v1243_v45  ;;  %968 = vst.msk [vmem:[%s2675_s27 + $0x1d] sm:$0x1] %vm644_vm9, %v952_v47  ;;  %v1550_v56 = vrot.slane %v1536_v48, %v2667_v27  ;;  %v1551_v57 = vcombine.high %v1543_v49, %v1543_v49  ;;  %v1559_v58 = vrot.slane %v1543_v49, %v2667_v27 }
 0x590   : > { %v1264_v60 = vrot.slane %v1236_v52, %v2667_v27  ;;  %v1266_v61 = vcombine.high %v1250_v53, %v1250_v53  ;;  %v1267_v62 = vcombine.high %v1257_v54, %v1257_v54  ;;  %1278 = vst.msk [vmem:[%s2675_s27 + $0x6] sm:$0x1] %vm644_vm9, %v1257_v54  ;;  %1279 = vst.msk [vmem:[%s2675_s27 + $0xa] sm:$0x1] %vm644_vm9, %v1265_v55 }
 0x591   : > { %1281 = vst.msk [vmem:[%s2675_s27 + $0x12] sm:$0x1] %vm644_vm9, %v1250_v53  ;;  %v1552_v1 = vcombine.high %v1550_v56, %v1550_v56  ;;  %v1566_v3 = vrot.slane %v1550_v56, %v2667_v27  ;;  %v1573_v5 = vrot.slane %v1551_v57, %v2667_v27  ;;  %v1581_v6 = vcombine.high %v1559_v58, %v1559_v58 }
 0x592   : > { %1593 = vst.msk [vmem:[%s2675_s27 + $0x3] sm:$0x1] %vm644_vm9, %v1559_v58  ;;  %v1268_v51 = vcombine.high %v1264_v60, %v1264_v60  ;;  %1280 = vst.msk [vmem:[%s2675_s27 + $0xe] sm:$0x1] %vm644_vm9, %v1267_v62 }
 0x593   : > { %1282 = vst.msk [vmem:[%s2675_s27 + $0x16] sm:$0x1] %vm644_vm9, %v1264_v60  ;;  %1283 = vst.msk [vmem:[%s2675_s27 + $0x1a] sm:$0x1] %vm644_vm9, %v1266_v61  ;;  %v1580_v7 = vrot.slane %v1552_v1, %v2667_v27  ;;  %v1582_v8 = vcombine.high %v1566_v3, %v1566_v3  ;;  %v1583_v9 = vcombine.high %v1573_v5, %v1573_v5 }
 0x594   : > { %1594 = vst.msk [vmem:[%s2675_s27 + $0x7] sm:$0x1] %vm644_vm9, %v1573_v5  ;;  %1595 = vst.msk [vmem:[%s2675_s27 + $0xb] sm:$0x1] %vm644_vm9, %v1581_v6 }
 0x595   : > { %1597 = vst.msk [vmem:[%s2675_s27 + $0x13] sm:$0x1] %vm644_vm9, %v1566_v3  ;;  %1284 = vst.msk [vmem:[%s2675_s27 + $0x1e] sm:$0x1] %vm644_vm9, %v1268_v51  ;;  %v1584_v27 = vcombine.high %v1580_v7, %v1580_v7 }
 0x596   : > { %1596 = vst.msk [vmem:[%s2675_s27 + $0xf] sm:$0x1] %vm644_vm9, %v1583_v9  ;;  %1598 = vst.msk [vmem:[%s2675_s27 + $0x17] sm:$0x1] %vm644_vm9, %v1580_v7 }
 0x597   : > { %1599 = vst.msk [vmem:[%s2675_s27 + $0x1b] sm:$0x1] %vm644_vm9, %v1582_v8  ;;  %1600 = vst.msk [vmem:[%s2675_s27 + $0x1f] sm:$0x1] %vm644_vm9, %v1584_v27 }
 0x598   : > { %2138 = shalt.err (!%p2135_p3)
}
 0x599   : > { %s2139_s27 = scalar_lea.hbm %s2855_s22, 512  ;;  %s2143_s6 = scalar_lea.hbm %s2919_s3, 1024 }
 0x59a   : > { %p2140_p5 = scmp.ne.s32.totalorder %s2855_s22, %s2139_s27  ;;  %p2144_p0 = scmp.lt.u32.totalorder %s2855_s22, %s2919_s3 }
 0x59b   : > { %p2145_p8 = scmp.lt.u32.totalorder %s2143_s6, %s2139_s27  ;;  %p2147_p12 = scmp.lt.u32.totalorder %s2139_s27, %s2855_s22 }
 0x59c   : > { %p2141_p2 = pnand %p2140_p5, %p2955_p6 }
 0x59d   : > { %p2146_p9 = por %p2145_p8, %p2144_p0 }
 0x59e   : > { %p2142_p1 = pneg %p2141_p2 }
 0x59f   : > { %p2148_p4 = por %p2147_p12, %p2146_p9 }
 0x5a1   : > { %p2149_p10 = pnand %p2148_p4, %p2142_p1 }
 0x5a3   : > { %2152 = shalt.err (!%p2149_p10)
}
 0x5a4   : > { %s2228_s0 = smov 64   ;;  %s2229_s10 = smov 128  }
 0x5a5   : > { %s2230_s8 = smov 4  }
 0x5a6   : > { %1909 = dma.vmem_to_hbm [thread:$0]  (%p2955_p6), %s2859_s21, 512, %s2855_s22, %s1616_s9, %s2228_s0, %s2229_s10, %s2230_s8  }
 0x5a7 PF: > { %s2956_s12 = sld [smem:[#allocation17_spill]]  ;;  %s1662_s24 = sand.u32 1, %s2195_s15  }
 0x5a8   : > { %p2957_p13 = scmp.ne.s32.totalorder %s2943_s30, 0  ;;  %s1663_s13 = scalar_lea.sflag [#allocation5], %s1662_s24 }
 0x5ad   : > { %p2958_p11 = scmp.ge.s32.totalorder %s2956_s12, 2 }
 0x5af   : > { %p1924_p7 = pnand %p2958_p11, %p2957_p13 }
 0x5b1   : > { %2186 = dma.done.wait (!%p1924_p7), %s1663_s13, 512  }
 0x5b2   : > { %2188 = vsyncadd (!%p1924_p7), %s1663_s13, 4294966784  ;;  %s1672_s19 = scalar_lea.sflag [#allocation11], %s1662_s24 }
 0x5b3   : > { %2190 = dma.done.wait (!%p1924_p7), %s1672_s19, 128  }
 0x5b4   : > { %2192 = vsyncadd (!%p1924_p7), %s1672_s19, 4294967168  ;;  %s27_s20 = sadd.s32 1, %s2956_s12   ;;  %s2959_s28 = sld [smem:[#allocation19_spill]] }
 0x5b5   : > { %p24_p3 = scmp.ge.s32.totalorder %s27_s20, 4   ;;  %s2960_s18 = sld [smem:[#allocation16_spill]] }
 0x5b6   : > { %s2961_s19 = sld [smem:[#allocation18_spill]]  ;;  %s2962_s15 = smov %s2199_s16 }
 0x5b7   : > { %s2963_s16 = smov %s2203_s17  ;;  %26 = sbr.rel (!%p24_p3) target bundleno = 13 (0xd), region = 126 }
 0x5ba   : > { %s2964_s17 = smov %s2959_s28 }
 0x5be   :  { %1677 = vsyncpa [#allocation4], 1 }
 0x5bf   :  { %1679 = vsyncpa [#allocation4 + $0x1], 1 }
 0x5c0   :  { %1680 = vsyncpa [#allocation7], 1 }
 0x5c1   :  { %1682 = vsyncpa [#allocation7 + $0x1], 1 }
 0x5c2   :  { %1683 = vsyncpa [#allocation5], 1 }
 0x5c3   :  { %1685 = vsyncpa [#allocation5 + $0x1], 1 }
 0x5c4   :  { %1686 = vsyncpa [#allocation11], 1 }
 0x5c5   :  { %1688 = vsyncpa [#allocation11 + $0x1], 1 }

</bundles_post_ra>
